<compile_context>
chip_gen: v6e
topology: v6e:2x2x1
jax: 0.10.0
libtpu: 0.0.40
codegen_flags: <defaults>
</compile_context>

<pallas_src>
import functools

import jax
import jax.numpy as jnp
from jax import lax
from jax.experimental import pallas as pl
from jax.experimental.pallas import tpu as pltpu


# ---------------------------------------------------------------------------
# Kernel A: 3x3 conv of one (image, row-tile) block + per-tile BN partials.
# ---------------------------------------------------------------------------
def _conv_stats_kernel(xm_ref, xh_ref, w_ref, b_ref, y_ref, st_ref, xc_ref, *,
                       w_out, valid_h, mask_rows, use_bias, relu_here):
    """Refs per grid step (n, i):
      xm_ref : (1, Cin, tile_h, Wp)  main padded-input rows of this tile
      xh_ref : (1, Cin, 8, Wp)       next 8 padded rows (only first 2 used)
      w_ref  : (9, Cout, Cin)        weights, tap index t = kh*3 + kw
      b_ref  : (Cout, 1)             conv bias (statically skipped if unused)
      y_ref  : (1, Cout, tile_h*W)   lane-dense flattened conv output
      st_ref : (1, 1, Cout, 2)       per-tile per-channel (sum, sumsq)
      xc_ref : VMEM (3, Cin, (tile_h+2)*W) scratch: three kw-shifted,
               width-compacted, lane-flattened copies of the input rows.
    """
    tile_h = xm_ref.shape[2]
    cout = w_ref.shape[1]
    W = w_out
    L = tile_h * W

    # ---- stage the tile_h + 2 input rows once per tile, compacted to width W
    # ---- and lane-flattened (this IS the im2col build, shared by all 9 taps;
    # ---- there is no separate pass-through staging copy any more).
    for r in range(tile_h + 2):                     # tile_h <= 32: small unroll
        if r < tile_h:
            row = xm_ref[0, :, r, :]                # (Cin, Wp)
        else:
            row = xh_ref[0, :, r - tile_h, :]       # 2 halo rows
        row = row.astype(xc_ref.dtype)
        for kw in range(3):
            xc_ref[kw, :, r * W:(r + 1) * W] = row[:, kw:kw + W]

    # ---- 3x3 conv for the whole tile: 9 accumulated MXU contractions, each
    # ---- (Cout, Cin) x (Cin, tile_h*W); result lanes = flattened (h, w).
    acc = jnp.zeros((cout, L), jnp.float32)
    for kh in range(3):
        for kw in range(3):
            rhs = xc_ref[kw, :, kh * W:kh * W + L]          # (Cin, L)
            acc = acc + jnp.dot(w_ref[kh * 3 + kw], rhs,
                                preferred_element_type=jnp.float32)

    if use_bias:                        # static flag; never a zeros add
        acc = acc + b_ref[...]          # (Cout, 1) broadcast over lanes
    if relu_here:                       # only when BN is disabled
        acc = jnp.maximum(acc, 0.0)

    y_ref[0] = acc.astype(y_ref.dtype)  # single dense (Cout, tile_h*W) store

    # ---- BN partial statistics, once per tile (masked for H-padding rows).
    yv = acc
    if mask_rows:
        lane = lax.broadcasted_iota(jnp.int32, (1, L), 1)
        row_in_tile = lane // W
        valid = (pl.program_id(1) * tile_h + row_in_tile) < valid_h
        yv = jnp.where(valid, yv, 0.0)
    st_ref[0, 0, :, 0:1] = jnp.sum(yv, axis=1, keepdims=True)
    st_ref[0, 0, :, 1:2] = jnp.sum(yv * yv, axis=1, keepdims=True)


# ---------------------------------------------------------------------------
# Kernel B: streaming BN affine (precomputed scale/shift) + ReLU, in place.
# ---------------------------------------------------------------------------
def _bn_act_kernel(y_ref, sc_ref, o_ref, *, relu):
    """y_ref/o_ref: (1, Cout, bl) lane-dense; sc_ref: (Cout, 2)=[scale,shift]."""
    y = y_ref[0]                                     # (Cout, bl)
    out = y * sc_ref[:, 0:1] + sc_ref[:, 1:2]
    if relu:
        out = jnp.maximum(out, 0.0)
    o_ref[0] = out.astype(o_ref.dtype)


# ---------------------------------------------------------------------------
# Tiling heuristics.
# ---------------------------------------------------------------------------
def _pick_tile_h(H2, W, N, max_tile=32):
    """Row-tile: multiple of 8, divides H2, tile_h*W % 128 == 0 (lane-dense),
    preferring N*T >= 4 grid steps (keeps both v7x TensorCores busy)."""
    cands = [t for t in range(8, min(H2, max_tile) + 1, 8)
             if H2 % t == 0 and (t * W) % 128 == 0]
    if not cands:
        return H2                       # single tile: block = full H2*W dim
    good = [t for t in cands if N * (H2 // t) >= 4]
    return max(good) if good else min(cands)


def _pick_spatial_block(S, cout, itemsize=4, budget_bytes=4 << 20):
    """Large lane-dense block for the streaming BN pass."""
    if cout * S * itemsize <= budget_bytes:
        return S
    best, d = 0, 128
    while d <= S and d * cout * itemsize <= budget_bytes:
        if S % d == 0:
            best = d
        d += 128
    return best if best else S


# ---------------------------------------------------------------------------
# Wrapper matching Layer.forward (NCHW in, NCHW out).
# ---------------------------------------------------------------------------
def layer_forward(x_nchw, weight_oihw, gamma=None, beta=None, bias=None, *,
                  bn_eps=None, act=True, tile_h=None, matmul_dtype=None):
    x = jnp.asarray(x_nchw, jnp.float32)
    weight = jnp.asarray(weight_oihw, jnp.float32)
    N, Cin, H, W = x.shape
    Cout = weight.shape[0]
    assert weight.shape == (Cout, Cin, 3, 3)

    if matmul_dtype is None:
        # bf16 MXU operands (f32 accumulation) once channels are non-trivial
        # (v5e/v6e: 2x throughput, half the weight VMEM); exact f32 otherwise.
        matmul_dtype = jnp.bfloat16 if Cin >= 64 else jnp.float32

    # ---- tile geometry --------------------------------------------------
    H2 = ((H + 7) // 8) * 8
    if tile_h is None:
        tile_h = _pick_tile_h(H2, W, N)
    assert tile_h % 8 == 0 and H2 % tile_h == 0
    T = H2 // tile_h
    th8 = tile_h // 8
    S = H2 * W
    Hp = H2 + tile_h                    # keeps the 8-row halo block in range
    Wp = W + 2

    # ---- wrapper glue: one zero-pad of x, tiny weight repack (no transposes
    # ---- or copies of the activation itself).
    xp = jnp.pad(x, ((0, 0), (0, 0), (1, Hp - H - 1), (1, 1)))
    wk = jnp.transpose(weight, (2, 3, 0, 1)).reshape(9, Cout, Cin)
    wk = wk.astype(matmul_dtype)
    # Conv bias is a per-channel constant, so it is an exact no-op when BN
    # follows; only apply it when BN is disabled.
    use_bias = (bias is not None) and (bn_eps is None)
    bvec = (jnp.zeros((Cout, 1), jnp.float32) if bias is None
            else jnp.asarray(bias, jnp.float32).reshape(Cout, 1))

    compiler_params = pltpu.CompilerParams(
        dimension_semantics=("parallel", "parallel"),
        vmem_limit_bytes=48 * 1024 * 1024)

    kernel_a = functools.partial(
        _conv_stats_kernel,
        w_out=W, valid_h=H, mask_rows=(H2 != H),
        use_bias=use_bias, relu_here=(act and bn_eps is None))

    y, pstats = pl.pallas_call(
        kernel_a,
        out_shape=(jax.ShapeDtypeStruct((N, Cout, S), jnp.float32),
                   jax.ShapeDtypeStruct((N, T, Cout, 2), jnp.float32)),
        grid=(N, T),
        in_specs=[
            pl.BlockSpec((1, Cin, tile_h, Wp), lambda n, i: (n, 0, i, 0)),
            pl.BlockSpec((1, Cin, 8, Wp),
                         lambda n, i: (n, 0, (i + 1) * th8, 0)),   # H halo
            pl.BlockSpec((9, Cout, Cin), lambda n, i: (0, 0, 0)),
            pl.BlockSpec((Cout, 1), lambda n, i: (0, 0)),
        ],
        out_specs=(
            pl.BlockSpec((1, Cout, tile_h * W), lambda n, i: (n, 0, i)),
            pl.BlockSpec((1, 1, Cout, 2), lambda n, i: (n, i, 0, 0)),
        ),
        scratch_shapes=[pltpu.VMEM((3, Cin, (tile_h + 2) * W), matmul_dtype)],
        compiler_params=compiler_params,
    )(xp, xp, wk, bvec)

    if bn_eps is None:
        out_flat = y
    else:
        g = (jnp.ones((Cout,), jnp.float32) if gamma is None
             else jnp.asarray(gamma, jnp.float32).reshape(-1))
        b = (jnp.zeros((Cout,), jnp.float32) if beta is None
             else jnp.asarray(beta, jnp.float32).reshape(-1))
        # Cross-tile reduction + per-channel finalize: O(Cout) XLA glue,
        # done once (not per grid step).
        stats = jnp.sum(pstats, axis=(0, 1))                       # (Cout, 2)
        cnt = float(N * H * W)
        mean = stats[:, 0] / cnt
        # TODO(synk): E[y^2]-mean^2 can lose precision for very large N*H*W;
        # switch to a shifted/Welford accumulation in that regime.
        var = jnp.maximum(stats[:, 1] / cnt - mean * mean, 0.0)
        scale = g * lax.rsqrt(var + bn_eps)
        shift = b - mean * scale
        sc = jnp.stack([scale, shift], axis=1)                      # (Cout, 2)

        bl = _pick_spatial_block(S, Cout)
        SB = S // bl
        kernel_b = functools.partial(_bn_act_kernel, relu=act)

        out_flat = pl.pallas_call(
            kernel_b,
            out_shape=jax.ShapeDtypeStruct((N, Cout, S), jnp.float32),
            grid=(N, SB),
            in_specs=[
                pl.BlockSpec((1, Cout, bl), lambda n, j: (n, 0, j)),
                pl.BlockSpec((Cout, 2), lambda n, j: (0, 0)),
            ],
            out_specs=pl.BlockSpec((1, Cout, bl), lambda n, j: (n, 0, j)),
            input_output_aliases={0: 0},          # overwrite y in place
            compiler_params=compiler_params,
        )(y, sc)

    out = out_flat.reshape(N, Cout, H2, W)        # free: contiguous reshape
    if H2 != H:
        out = out[:, :, :H, :]
    return out


# ---------------------------------------------------------------------------
# Pure-JAX reference for the correctness check.
# ---------------------------------------------------------------------------
def _reference(x, weight, gamma, beta, *, bn_eps, act):
    y = lax.conv_general_dilated(
        x, weight, window_strides=(1, 1), padding="SAME",
        dimension_numbers=("NCHW", "OIHW", "NCHW"))
    if bn_eps is not None:
        mean = jnp.mean(y, axis=(0, 2, 3), keepdims=True)
        var = jnp.mean((y - mean) ** 2, axis=(0, 2, 3), keepdims=True)
        y = (y - mean) * lax.rsqrt(var + bn_eps)
        y = y * gamma.reshape(1, -1, 1, 1) + beta.reshape(1, -1, 1, 1)
    if act:
        y = jnp.maximum(y, 0.0)
    return y


if __name__ == "__main__":
    # Layer(in_channels=4, out_channels=8, bn_eps=1e-5, bias=False, act=True)
    # applied to x of shape (2, 4, 16, 16).
    N, Cin, Cout, H, W = 2, 4, 8, 16, 16
    bn_eps = 1e-5

    key = jax.random.PRNGKey(0)
    kx, kw = jax.random.split(key, 2)
    x = jax.random.normal(kx, (N, Cin, H, W), dtype=jnp.float32)
    weight = 0.1 * jax.random.normal(kw, (Cout, Cin, 3, 3), dtype=jnp.float32)
    gamma = 1.0 + 0.1 * jnp.arange(Cout, dtype=jnp.float32)   # BN weight
    beta = 0.05 * jnp.arange(Cout, dtype=jnp.float32)         # BN bias

    fwd = jax.jit(functools.partial(layer_forward, bn_eps=bn_eps, act=True))
    out = fwd(x, weight, gamma, beta)
    out = jax.block_until_ready(out)

    ref = _reference(x, weight, gamma, beta, bn_eps=bn_eps, act=True)
    assert out.shape == (N, Cout, H, W)
    max_err = float(jnp.max(jnp.abs(out - ref)))
    assert max_err < 5e-4, f"mismatch vs reference: max_err={max_err}"

    print("KERNEL_OK")
</pallas_src>

<mosaic_0001>
module attributes {stable_mosaic.version = 11 : i64} {
  func.func @_conv_stats_kernel(%arg0: i32, %arg1: i32, %arg2: memref<1x4x8x18xf32, #tpu.memory_space<vmem>>, %arg3: memref<1x4x8x18xf32, #tpu.memory_space<vmem>>, %arg4: memref<9x8x4xf32, #tpu.memory_space<vmem>>, %arg5: memref<8x1xf32, #tpu.memory_space<vmem>>, %arg6: memref<1x8x128xf32, #tpu.memory_space<vmem>>, %arg7: memref<1x1x8x2xf32, #tpu.memory_space<vmem>>, %arg8: memref<3x4x160xf32, #tpu.memory_space<vmem>>) attributes {dimension_semantics = [#tpu.dimension_semantics<parallel>, #tpu.dimension_semantics<parallel>], iteration_bounds = array<i64: 2, 2>, scalar_prefetch = 0 : i64, scratch_operands = 1 : i64, tpu.core_type = #tpu.core_type<tc>, window_params = [{transform_indices = @transform_0, window_bounds = array<i64: 1, 4, 8, 18>}, {transform_indices = @transform_1, window_bounds = array<i64: 1, 4, 8, 18>}, {pipeline_mode = #tpu.pipeline_mode<synchronous>, transform_indices = @transform_2, window_bounds = array<i64: 9, 8, 4>}, {pipeline_mode = #tpu.pipeline_mode<synchronous>, transform_indices = @transform_3, window_bounds = array<i64: 8, 1>}, {transform_indices = @transform_4, window_bounds = array<i64: 1, 8, 128>}, {transform_indices = @transform_5, window_bounds = array<i64: 1, 1, 8, 2>}]} {
    %c0 = arith.constant 0 : index
    %c0_0 = arith.constant 0 : index
    %c0_1 = arith.constant 0 : index
    %c0_2 = arith.constant 0 : index
    %0 = vector.load %arg2[%c0, %c0_0, %c0_1, %c0_2] : memref<1x4x8x18xf32, #tpu.memory_space<vmem>>, vector<1x4x1x18xf32>
    %1 = vector.shape_cast %0 : vector<1x4x1x18xf32> to vector<4x18xf32>
    %2 = vector.extract_strided_slice %1 {offsets = [0, 0], sizes = [4, 16], strides = [1, 1]} : vector<4x18xf32> to vector<4x16xf32>
    %c0_3 = arith.constant 0 : index
    %c0_4 = arith.constant 0 : index
    %c0_5 = arith.constant 0 : index
    %3 = vector.load %arg8[%c0_3, %c0_4, %c0_5] : memref<3x4x160xf32, #tpu.memory_space<vmem>>, vector<1x4x16xf32>
    %4 = vector.shape_cast %3 : vector<1x4x16xf32> to vector<4x16xf32>
    %5 = vector.shape_cast %2 : vector<4x16xf32> to vector<1x4x16xf32>
    tpu.vector_store %arg8[%c0_3, %c0_4, %c0_5], %5 {strides = array<i32>} : memref<3x4x160xf32, #tpu.memory_space<vmem>>, vector<1x4x16xf32>,
    %6 = vector.extract_strided_slice %1 {offsets = [0, 1], sizes = [4, 16], strides = [1, 1]} : vector<4x18xf32> to vector<4x16xf32>
    %c1 = arith.constant 1 : index
    %c0_6 = arith.constant 0 : index
    %c0_7 = arith.constant 0 : index
    %7 = vector.load %arg8[%c1, %c0_6, %c0_7] : memref<3x4x160xf32, #tpu.memory_space<vmem>>, vector<1x4x16xf32>
    %8 = vector.shape_cast %7 : vector<1x4x16xf32> to vector<4x16xf32>
    %9 = vector.shape_cast %6 : vector<4x16xf32> to vector<1x4x16xf32>
    tpu.vector_store %arg8[%c1, %c0_6, %c0_7], %9 {strides = array<i32>} : memref<3x4x160xf32, #tpu.memory_space<vmem>>, vector<1x4x16xf32>,
    %10 = vector.extract_strided_slice %1 {offsets = [0, 2], sizes = [4, 16], strides = [1, 1]} : vector<4x18xf32> to vector<4x16xf32>
    %c2 = arith.constant 2 : index
    %c0_8 = arith.constant 0 : index
    %c0_9 = arith.constant 0 : index
    %11 = vector.load %arg8[%c2, %c0_8, %c0_9] : memref<3x4x160xf32, #tpu.memory_space<vmem>>, vector<1x4x16xf32>
    %12 = vector.shape_cast %11 : vector<1x4x16xf32> to vector<4x16xf32>
    %13 = vector.shape_cast %10 : vector<4x16xf32> to vector<1x4x16xf32>
    tpu.vector_store %arg8[%c2, %c0_8, %c0_9], %13 {strides = array<i32>} : memref<3x4x160xf32, #tpu.memory_space<vmem>>, vector<1x4x16xf32>,
    %c0_10 = arith.constant 0 : index
    %c0_11 = arith.constant 0 : index
    %c1_12 = arith.constant 1 : index
    %c0_13 = arith.constant 0 : index
    %14 = vector.load %arg2[%c0_10, %c0_11, %c1_12, %c0_13] : memref<1x4x8x18xf32, #tpu.memory_space<vmem>>, vector<1x4x1x18xf32>
    %15 = vector.shape_cast %14 : vector<1x4x1x18xf32> to vector<4x18xf32>
    %16 = vector.extract_strided_slice %15 {offsets = [0, 0], sizes = [4, 16], strides = [1, 1]} : vector<4x18xf32> to vector<4x16xf32>
    %c0_14 = arith.constant 0 : index
    %c0_15 = arith.constant 0 : index
    %c16 = arith.constant 16 : index
    %17 = vector.load %arg8[%c0_14, %c0_15, %c16] : memref<3x4x160xf32, #tpu.memory_space<vmem>>, vector<1x4x16xf32>
    %18 = vector.shape_cast %17 : vector<1x4x16xf32> to vector<4x16xf32>
    %19 = vector.shape_cast %16 : vector<4x16xf32> to vector<1x4x16xf32>
    tpu.vector_store %arg8[%c0_14, %c0_15, %c16], %19 {strides = array<i32>} : memref<3x4x160xf32, #tpu.memory_space<vmem>>, vector<1x4x16xf32>,
    %20 = vector.extract_strided_slice %15 {offsets = [0, 1], sizes = [4, 16], strides = [1, 1]} : vector<4x18xf32> to vector<4x16xf32>
    %c1_16 = arith.constant 1 : index
    %c0_17 = arith.constant 0 : index
    %c16_18 = arith.constant 16 : index
    %21 = vector.load %arg8[%c1_16, %c0_17, %c16_18] : memref<3x4x160xf32, #tpu.memory_space<vmem>>, vector<1x4x16xf32>
    %22 = vector.shape_cast %21 : vector<1x4x16xf32> to vector<4x16xf32>
    %23 = vector.shape_cast %20 : vector<4x16xf32> to vector<1x4x16xf32>
    tpu.vector_store %arg8[%c1_16, %c0_17, %c16_18], %23 {strides = array<i32>} : memref<3x4x160xf32, #tpu.memory_space<vmem>>, vector<1x4x16xf32>,
    %24 = vector.extract_strided_slice %15 {offsets = [0, 2], sizes = [4, 16], strides = [1, 1]} : vector<4x18xf32> to vector<4x16xf32>
    %c2_19 = arith.constant 2 : index
    %c0_20 = arith.constant 0 : index
    %c16_21 = arith.constant 16 : index
    %25 = vector.load %arg8[%c2_19, %c0_20, %c16_21] : memref<3x4x160xf32, #tpu.memory_space<vmem>>, vector<1x4x16xf32>
    %26 = vector.shape_cast %25 : vector<1x4x16xf32> to vector<4x16xf32>
    %27 = vector.shape_cast %24 : vector<4x16xf32> to vector<1x4x16xf32>
    tpu.vector_store %arg8[%c2_19, %c0_20, %c16_21], %27 {strides = array<i32>} : memref<3x4x160xf32, #tpu.memory_space<vmem>>, vector<1x4x16xf32>,
    %c0_22 = arith.constant 0 : index
    %c0_23 = arith.constant 0 : index
    %c2_24 = arith.constant 2 : index
    %c0_25 = arith.constant 0 : index
    %28 = vector.load %arg2[%c0_22, %c0_23, %c2_24, %c0_25] : memref<1x4x8x18xf32, #tpu.memory_space<vmem>>, vector<1x4x1x18xf32>
    %29 = vector.shape_cast %28 : vector<1x4x1x18xf32> to vector<4x18xf32>
    %30 = vector.extract_strided_slice %29 {offsets = [0, 0], sizes = [4, 16], strides = [1, 1]} : vector<4x18xf32> to vector<4x16xf32>
    %c0_26 = arith.constant 0 : index
    %c0_27 = arith.constant 0 : index
    %c32 = arith.constant 32 : index
    %31 = vector.load %arg8[%c0_26, %c0_27, %c32] : memref<3x4x160xf32, #tpu.memory_space<vmem>>, vector<1x4x16xf32>
    %32 = vector.shape_cast %31 : vector<1x4x16xf32> to vector<4x16xf32>
    %33 = vector.shape_cast %30 : vector<4x16xf32> to vector<1x4x16xf32>
    tpu.vector_store %arg8[%c0_26, %c0_27, %c32], %33 {strides = array<i32>} : memref<3x4x160xf32, #tpu.memory_space<vmem>>, vector<1x4x16xf32>,
    %34 = vector.extract_strided_slice %29 {offsets = [0, 1], sizes = [4, 16], strides = [1, 1]} : vector<4x18xf32> to vector<4x16xf32>
    %c1_28 = arith.constant 1 : index
    %c0_29 = arith.constant 0 : index
    %c32_30 = arith.constant 32 : index
    %35 = vector.load %arg8[%c1_28, %c0_29, %c32_30] : memref<3x4x160xf32, #tpu.memory_space<vmem>>, vector<1x4x16xf32>
    %36 = vector.shape_cast %35 : vector<1x4x16xf32> to vector<4x16xf32>
    %37 = vector.shape_cast %34 : vector<4x16xf32> to vector<1x4x16xf32>
    tpu.vector_store %arg8[%c1_28, %c0_29, %c32_30], %37 {strides = array<i32>} : memref<3x4x160xf32, #tpu.memory_space<vmem>>, vector<1x4x16xf32>,
    %38 = vector.extract_strided_slice %29 {offsets = [0, 2], sizes = [4, 16], strides = [1, 1]} : vector<4x18xf32> to vector<4x16xf32>
    %c2_31 = arith.constant 2 : index
    %c0_32 = arith.constant 0 : index
    %c32_33 = arith.constant 32 : index
    %39 = vector.load %arg8[%c2_31, %c0_32, %c32_33] : memref<3x4x160xf32, #tpu.memory_space<vmem>>, vector<1x4x16xf32>
    %40 = vector.shape_cast %39 : vector<1x4x16xf32> to vector<4x16xf32>
    %41 = vector.shape_cast %38 : vector<4x16xf32> to vector<1x4x16xf32>
    tpu.vector_store %arg8[%c2_31, %c0_32, %c32_33], %41 {strides = array<i32>} : memref<3x4x160xf32, #tpu.memory_space<vmem>>, vector<1x4x16xf32>,
    %c0_34 = arith.constant 0 : index
    %c0_35 = arith.constant 0 : index
    %c3 = arith.constant 3 : index
    %c0_36 = arith.constant 0 : index
    %42 = vector.load %arg2[%c0_34, %c0_35, %c3, %c0_36] : memref<1x4x8x18xf32, #tpu.memory_space<vmem>>, vector<1x4x1x18xf32>
    %43 = vector.shape_cast %42 : vector<1x4x1x18xf32> to vector<4x18xf32>
    %44 = vector.extract_strided_slice %43 {offsets = [0, 0], sizes = [4, 16], strides = [1, 1]} : vector<4x18xf32> to vector<4x16xf32>
    %c0_37 = arith.constant 0 : index
    %c0_38 = arith.constant 0 : index
    %c48 = arith.constant 48 : index
    %45 = vector.load %arg8[%c0_37, %c0_38, %c48] : memref<3x4x160xf32, #tpu.memory_space<vmem>>, vector<1x4x16xf32>
    %46 = vector.shape_cast %45 : vector<1x4x16xf32> to vector<4x16xf32>
    %47 = vector.shape_cast %44 : vector<4x16xf32> to vector<1x4x16xf32>
    tpu.vector_store %arg8[%c0_37, %c0_38, %c48], %47 {strides = array<i32>} : memref<3x4x160xf32, #tpu.memory_space<vmem>>, vector<1x4x16xf32>,
    %48 = vector.extract_strided_slice %43 {offsets = [0, 1], sizes = [4, 16], strides = [1, 1]} : vector<4x18xf32> to vector<4x16xf32>
    %c1_39 = arith.constant 1 : index
    %c0_40 = arith.constant 0 : index
    %c48_41 = arith.constant 48 : index
    %49 = vector.load %arg8[%c1_39, %c0_40, %c48_41] : memref<3x4x160xf32, #tpu.memory_space<vmem>>, vector<1x4x16xf32>
    %50 = vector.shape_cast %49 : vector<1x4x16xf32> to vector<4x16xf32>
    %51 = vector.shape_cast %48 : vector<4x16xf32> to vector<1x4x16xf32>
    tpu.vector_store %arg8[%c1_39, %c0_40, %c48_41], %51 {strides = array<i32>} : memref<3x4x160xf32, #tpu.memory_space<vmem>>, vector<1x4x16xf32>,
    %52 = vector.extract_strided_slice %43 {offsets = [0, 2], sizes = [4, 16], strides = [1, 1]} : vector<4x18xf32> to vector<4x16xf32>
    %c2_42 = arith.constant 2 : index
    %c0_43 = arith.constant 0 : index
    %c48_44 = arith.constant 48 : index
    %53 = vector.load %arg8[%c2_42, %c0_43, %c48_44] : memref<3x4x160xf32, #tpu.memory_space<vmem>>, vector<1x4x16xf32>
    %54 = vector.shape_cast %53 : vector<1x4x16xf32> to vector<4x16xf32>
    %55 = vector.shape_cast %52 : vector<4x16xf32> to vector<1x4x16xf32>
    tpu.vector_store %arg8[%c2_42, %c0_43, %c48_44], %55 {strides = array<i32>} : memref<3x4x160xf32, #tpu.memory_space<vmem>>, vector<1x4x16xf32>,
    %c0_45 = arith.constant 0 : index
    %c0_46 = arith.constant 0 : index
    %c4 = arith.constant 4 : index
    %c0_47 = arith.constant 0 : index
    %56 = vector.load %arg2[%c0_45, %c0_46, %c4, %c0_47] : memref<1x4x8x18xf32, #tpu.memory_space<vmem>>, vector<1x4x1x18xf32>
    %57 = vector.shape_cast %56 : vector<1x4x1x18xf32> to vector<4x18xf32>
    %58 = vector.extract_strided_slice %57 {offsets = [0, 0], sizes = [4, 16], strides = [1, 1]} : vector<4x18xf32> to vector<4x16xf32>
    %c0_48 = arith.constant 0 : index
    %c0_49 = arith.constant 0 : index
    %c64 = arith.constant 64 : index
    %59 = vector.load %arg8[%c0_48, %c0_49, %c64] : memref<3x4x160xf32, #tpu.memory_space<vmem>>, vector<1x4x16xf32>
    %60 = vector.shape_cast %59 : vector<1x4x16xf32> to vector<4x16xf32>
    %61 = vector.shape_cast %58 : vector<4x16xf32> to vector<1x4x16xf32>
    tpu.vector_store %arg8[%c0_48, %c0_49, %c64], %61 {strides = array<i32>} : memref<3x4x160xf32, #tpu.memory_space<vmem>>, vector<1x4x16xf32>,
    %62 = vector.extract_strided_slice %57 {offsets = [0, 1], sizes = [4, 16], strides = [1, 1]} : vector<4x18xf32> to vector<4x16xf32>
    %c1_50 = arith.constant 1 : index
    %c0_51 = arith.constant 0 : index
    %c64_52 = arith.constant 64 : index
    %63 = vector.load %arg8[%c1_50, %c0_51, %c64_52] : memref<3x4x160xf32, #tpu.memory_space<vmem>>, vector<1x4x16xf32>
    %64 = vector.shape_cast %63 : vector<1x4x16xf32> to vector<4x16xf32>
    %65 = vector.shape_cast %62 : vector<4x16xf32> to vector<1x4x16xf32>
    tpu.vector_store %arg8[%c1_50, %c0_51, %c64_52], %65 {strides = array<i32>} : memref<3x4x160xf32, #tpu.memory_space<vmem>>, vector<1x4x16xf32>,
    %66 = vector.extract_strided_slice %57 {offsets = [0, 2], sizes = [4, 16], strides = [1, 1]} : vector<4x18xf32> to vector<4x16xf32>
    %c2_53 = arith.constant 2 : index
    %c0_54 = arith.constant 0 : index
    %c64_55 = arith.constant 64 : index
    %67 = vector.load %arg8[%c2_53, %c0_54, %c64_55] : memref<3x4x160xf32, #tpu.memory_space<vmem>>, vector<1x4x16xf32>
    %68 = vector.shape_cast %67 : vector<1x4x16xf32> to vector<4x16xf32>
    %69 = vector.shape_cast %66 : vector<4x16xf32> to vector<1x4x16xf32>
    tpu.vector_store %arg8[%c2_53, %c0_54, %c64_55], %69 {strides = array<i32>} : memref<3x4x160xf32, #tpu.memory_space<vmem>>, vector<1x4x16xf32>,
    %c0_56 = arith.constant 0 : index
    %c0_57 = arith.constant 0 : index
    %c5 = arith.constant 5 : index
    %c0_58 = arith.constant 0 : index
    %70 = vector.load %arg2[%c0_56, %c0_57, %c5, %c0_58] : memref<1x4x8x18xf32, #tpu.memory_space<vmem>>, vector<1x4x1x18xf32>
    %71 = vector.shape_cast %70 : vector<1x4x1x18xf32> to vector<4x18xf32>
    %72 = vector.extract_strided_slice %71 {offsets = [0, 0], sizes = [4, 16], strides = [1, 1]} : vector<4x18xf32> to vector<4x16xf32>
    %c0_59 = arith.constant 0 : index
    %c0_60 = arith.constant 0 : index
    %c80 = arith.constant 80 : index
    %73 = vector.load %arg8[%c0_59, %c0_60, %c80] : memref<3x4x160xf32, #tpu.memory_space<vmem>>, vector<1x4x16xf32>
    %74 = vector.shape_cast %73 : vector<1x4x16xf32> to vector<4x16xf32>
    %75 = vector.shape_cast %72 : vector<4x16xf32> to vector<1x4x16xf32>
    tpu.vector_store %arg8[%c0_59, %c0_60, %c80], %75 {strides = array<i32>} : memref<3x4x160xf32, #tpu.memory_space<vmem>>, vector<1x4x16xf32>,
    %76 = vector.extract_strided_slice %71 {offsets = [0, 1], sizes = [4, 16], strides = [1, 1]} : vector<4x18xf32> to vector<4x16xf32>
    %c1_61 = arith.constant 1 : index
    %c0_62 = arith.constant 0 : index
    %c80_63 = arith.constant 80 : index
    %77 = vector.load %arg8[%c1_61, %c0_62, %c80_63] : memref<3x4x160xf32, #tpu.memory_space<vmem>>, vector<1x4x16xf32>
    %78 = vector.shape_cast %77 : vector<1x4x16xf32> to vector<4x16xf32>
    %79 = vector.shape_cast %76 : vector<4x16xf32> to vector<1x4x16xf32>
    tpu.vector_store %arg8[%c1_61, %c0_62, %c80_63], %79 {strides = array<i32>} : memref<3x4x160xf32, #tpu.memory_space<vmem>>, vector<1x4x16xf32>,
    %80 = vector.extract_strided_slice %71 {offsets = [0, 2], sizes = [4, 16], strides = [1, 1]} : vector<4x18xf32> to vector<4x16xf32>
    %c2_64 = arith.constant 2 : index
    %c0_65 = arith.constant 0 : index
    %c80_66 = arith.constant 80 : index
    %81 = vector.load %arg8[%c2_64, %c0_65, %c80_66] : memref<3x4x160xf32, #tpu.memory_space<vmem>>, vector<1x4x16xf32>
    %82 = vector.shape_cast %81 : vector<1x4x16xf32> to vector<4x16xf32>
    %83 = vector.shape_cast %80 : vector<4x16xf32> to vector<1x4x16xf32>
    tpu.vector_store %arg8[%c2_64, %c0_65, %c80_66], %83 {strides = array<i32>} : memref<3x4x160xf32, #tpu.memory_space<vmem>>, vector<1x4x16xf32>,
    %c0_67 = arith.constant 0 : index
    %c0_68 = arith.constant 0 : index
    %c6 = arith.constant 6 : index
    %c0_69 = arith.constant 0 : index
    %84 = vector.load %arg2[%c0_67, %c0_68, %c6, %c0_69] : memref<1x4x8x18xf32, #tpu.memory_space<vmem>>, vector<1x4x1x18xf32>
    %85 = vector.shape_cast %84 : vector<1x4x1x18xf32> to vector<4x18xf32>
    %86 = vector.extract_strided_slice %85 {offsets = [0, 0], sizes = [4, 16], strides = [1, 1]} : vector<4x18xf32> to vector<4x16xf32>
    %c0_70 = arith.constant 0 : index
    %c0_71 = arith.constant 0 : index
    %c96 = arith.constant 96 : index
    %87 = vector.load %arg8[%c0_70, %c0_71, %c96] : memref<3x4x160xf32, #tpu.memory_space<vmem>>, vector<1x4x16xf32>
    %88 = vector.shape_cast %87 : vector<1x4x16xf32> to vector<4x16xf32>
    %89 = vector.shape_cast %86 : vector<4x16xf32> to vector<1x4x16xf32>
    tpu.vector_store %arg8[%c0_70, %c0_71, %c96], %89 {strides = array<i32>} : memref<3x4x160xf32, #tpu.memory_space<vmem>>, vector<1x4x16xf32>,
    %90 = vector.extract_strided_slice %85 {offsets = [0, 1], sizes = [4, 16], strides = [1, 1]} : vector<4x18xf32> to vector<4x16xf32>
    %c1_72 = arith.constant 1 : index
    %c0_73 = arith.constant 0 : index
    %c96_74 = arith.constant 96 : index
    %91 = vector.load %arg8[%c1_72, %c0_73, %c96_74] : memref<3x4x160xf32, #tpu.memory_space<vmem>>, vector<1x4x16xf32>
    %92 = vector.shape_cast %91 : vector<1x4x16xf32> to vector<4x16xf32>
    %93 = vector.shape_cast %90 : vector<4x16xf32> to vector<1x4x16xf32>
    tpu.vector_store %arg8[%c1_72, %c0_73, %c96_74], %93 {strides = array<i32>} : memref<3x4x160xf32, #tpu.memory_space<vmem>>, vector<1x4x16xf32>,
    %94 = vector.extract_strided_slice %85 {offsets = [0, 2], sizes = [4, 16], strides = [1, 1]} : vector<4x18xf32> to vector<4x16xf32>
    %c2_75 = arith.constant 2 : index
    %c0_76 = arith.constant 0 : index
    %c96_77 = arith.constant 96 : index
    %95 = vector.load %arg8[%c2_75, %c0_76, %c96_77] : memref<3x4x160xf32, #tpu.memory_space<vmem>>, vector<1x4x16xf32>
    %96 = vector.shape_cast %95 : vector<1x4x16xf32> to vector<4x16xf32>
    %97 = vector.shape_cast %94 : vector<4x16xf32> to vector<1x4x16xf32>
    tpu.vector_store %arg8[%c2_75, %c0_76, %c96_77], %97 {strides = array<i32>} : memref<3x4x160xf32, #tpu.memory_space<vmem>>, vector<1x4x16xf32>,
    %c0_78 = arith.constant 0 : index
    %c0_79 = arith.constant 0 : index
    %c7 = arith.constant 7 : index
    %c0_80 = arith.constant 0 : index
    %98 = vector.load %arg2[%c0_78, %c0_79, %c7, %c0_80] : memref<1x4x8x18xf32, #tpu.memory_space<vmem>>, vector<1x4x1x18xf32>
    %99 = vector.shape_cast %98 : vector<1x4x1x18xf32> to vector<4x18xf32>
    %100 = vector.extract_strided_slice %99 {offsets = [0, 0], sizes = [4, 16], strides = [1, 1]} : vector<4x18xf32> to vector<4x16xf32>
    %c0_81 = arith.constant 0 : index
    %c0_82 = arith.constant 0 : index
    %c112 = arith.constant 112 : index
    %101 = vector.load %arg8[%c0_81, %c0_82, %c112] : memref<3x4x160xf32, #tpu.memory_space<vmem>>, vector<1x4x16xf32>
    %102 = vector.shape_cast %101 : vector<1x4x16xf32> to vector<4x16xf32>
    %103 = vector.shape_cast %100 : vector<4x16xf32> to vector<1x4x16xf32>
    tpu.vector_store %arg8[%c0_81, %c0_82, %c112], %103 {strides = array<i32>} : memref<3x4x160xf32, #tpu.memory_space<vmem>>, vector<1x4x16xf32>,
    %104 = vector.extract_strided_slice %99 {offsets = [0, 1], sizes = [4, 16], strides = [1, 1]} : vector<4x18xf32> to vector<4x16xf32>
    %c1_83 = arith.constant 1 : index
    %c0_84 = arith.constant 0 : index
    %c112_85 = arith.constant 112 : index
    %105 = vector.load %arg8[%c1_83, %c0_84, %c112_85] : memref<3x4x160xf32, #tpu.memory_space<vmem>>, vector<1x4x16xf32>
    %106 = vector.shape_cast %105 : vector<1x4x16xf32> to vector<4x16xf32>
    %107 = vector.shape_cast %104 : vector<4x16xf32> to vector<1x4x16xf32>
    tpu.vector_store %arg8[%c1_83, %c0_84, %c112_85], %107 {strides = array<i32>} : memref<3x4x160xf32, #tpu.memory_space<vmem>>, vector<1x4x16xf32>,
    %108 = vector.extract_strided_slice %99 {offsets = [0, 2], sizes = [4, 16], strides = [1, 1]} : vector<4x18xf32> to vector<4x16xf32>
    %c2_86 = arith.constant 2 : index
    %c0_87 = arith.constant 0 : index
    %c112_88 = arith.constant 112 : index
    %109 = vector.load %arg8[%c2_86, %c0_87, %c112_88] : memref<3x4x160xf32, #tpu.memory_space<vmem>>, vector<1x4x16xf32>
    %110 = vector.shape_cast %109 : vector<1x4x16xf32> to vector<4x16xf32>
    %111 = vector.shape_cast %108 : vector<4x16xf32> to vector<1x4x16xf32>
    tpu.vector_store %arg8[%c2_86, %c0_87, %c112_88], %111 {strides = array<i32>} : memref<3x4x160xf32, #tpu.memory_space<vmem>>, vector<1x4x16xf32>,
    %c0_89 = arith.constant 0 : index
    %c0_90 = arith.constant 0 : index
    %c0_91 = arith.constant 0 : index
    %c0_92 = arith.constant 0 : index
    %112 = vector.load %arg3[%c0_89, %c0_90, %c0_91, %c0_92] : memref<1x4x8x18xf32, #tpu.memory_space<vmem>>, vector<1x4x1x18xf32>
    %113 = vector.shape_cast %112 : vector<1x4x1x18xf32> to vector<4x18xf32>
    %114 = vector.extract_strided_slice %113 {offsets = [0, 0], sizes = [4, 16], strides = [1, 1]} : vector<4x18xf32> to vector<4x16xf32>
    %c0_93 = arith.constant 0 : index
    %c0_94 = arith.constant 0 : index
    %c128 = arith.constant 128 : index
    %115 = vector.load %arg8[%c0_93, %c0_94, %c128] : memref<3x4x160xf32, #tpu.memory_space<vmem>>, vector<1x4x16xf32>
    %116 = vector.shape_cast %115 : vector<1x4x16xf32> to vector<4x16xf32>
    %117 = vector.shape_cast %114 : vector<4x16xf32> to vector<1x4x16xf32>
    tpu.vector_store %arg8[%c0_93, %c0_94, %c128], %117 {strides = array<i32>} : memref<3x4x160xf32, #tpu.memory_space<vmem>>, vector<1x4x16xf32>,
    %118 = vector.extract_strided_slice %113 {offsets = [0, 1], sizes = [4, 16], strides = [1, 1]} : vector<4x18xf32> to vector<4x16xf32>
    %c1_95 = arith.constant 1 : index
    %c0_96 = arith.constant 0 : index
    %c128_97 = arith.constant 128 : index
    %119 = vector.load %arg8[%c1_95, %c0_96, %c128_97] : memref<3x4x160xf32, #tpu.memory_space<vmem>>, vector<1x4x16xf32>
    %120 = vector.shape_cast %119 : vector<1x4x16xf32> to vector<4x16xf32>
    %121 = vector.shape_cast %118 : vector<4x16xf32> to vector<1x4x16xf32>
    tpu.vector_store %arg8[%c1_95, %c0_96, %c128_97], %121 {strides = array<i32>} : memref<3x4x160xf32, #tpu.memory_space<vmem>>, vector<1x4x16xf32>,
    %122 = vector.extract_strided_slice %113 {offsets = [0, 2], sizes = [4, 16], strides = [1, 1]} : vector<4x18xf32> to vector<4x16xf32>
    %c2_98 = arith.constant 2 : index
    %c0_99 = arith.constant 0 : index
    %c128_100 = arith.constant 128 : index
    %123 = vector.load %arg8[%c2_98, %c0_99, %c128_100] : memref<3x4x160xf32, #tpu.memory_space<vmem>>, vector<1x4x16xf32>
    %124 = vector.shape_cast %123 : vector<1x4x16xf32> to vector<4x16xf32>
    %125 = vector.shape_cast %122 : vector<4x16xf32> to vector<1x4x16xf32>
    tpu.vector_store %arg8[%c2_98, %c0_99, %c128_100], %125 {strides = array<i32>} : memref<3x4x160xf32, #tpu.memory_space<vmem>>, vector<1x4x16xf32>,
    %c0_101 = arith.constant 0 : index
    %c0_102 = arith.constant 0 : index
    %c1_103 = arith.constant 1 : index
    %c0_104 = arith.constant 0 : index
    %126 = vector.load %arg3[%c0_101, %c0_102, %c1_103, %c0_104] : memref<1x4x8x18xf32, #tpu.memory_space<vmem>>, vector<1x4x1x18xf32>
    %127 = vector.shape_cast %126 : vector<1x4x1x18xf32> to vector<4x18xf32>
    %128 = vector.extract_strided_slice %127 {offsets = [0, 0], sizes = [4, 16], strides = [1, 1]} : vector<4x18xf32> to vector<4x16xf32>
    %c0_105 = arith.constant 0 : index
    %c0_106 = arith.constant 0 : index
    %c144 = arith.constant 144 : index
    %129 = vector.load %arg8[%c0_105, %c0_106, %c144] : memref<3x4x160xf32, #tpu.memory_space<vmem>>, vector<1x4x16xf32>
    %130 = vector.shape_cast %129 : vector<1x4x16xf32> to vector<4x16xf32>
    %131 = vector.shape_cast %128 : vector<4x16xf32> to vector<1x4x16xf32>
    tpu.vector_store %arg8[%c0_105, %c0_106, %c144], %131 {strides = array<i32>} : memref<3x4x160xf32, #tpu.memory_space<vmem>>, vector<1x4x16xf32>,
    %132 = vector.extract_strided_slice %127 {offsets = [0, 1], sizes = [4, 16], strides = [1, 1]} : vector<4x18xf32> to vector<4x16xf32>
    %c1_107 = arith.constant 1 : index
    %c0_108 = arith.constant 0 : index
    %c144_109 = arith.constant 144 : index
    %133 = vector.load %arg8[%c1_107, %c0_108, %c144_109] : memref<3x4x160xf32, #tpu.memory_space<vmem>>, vector<1x4x16xf32>
    %134 = vector.shape_cast %133 : vector<1x4x16xf32> to vector<4x16xf32>
    %135 = vector.shape_cast %132 : vector<4x16xf32> to vector<1x4x16xf32>
    tpu.vector_store %arg8[%c1_107, %c0_108, %c144_109], %135 {strides = array<i32>} : memref<3x4x160xf32, #tpu.memory_space<vmem>>, vector<1x4x16xf32>,
    %136 = vector.extract_strided_slice %127 {offsets = [0, 2], sizes = [4, 16], strides = [1, 1]} : vector<4x18xf32> to vector<4x16xf32>
    %c2_110 = arith.constant 2 : index
    %c0_111 = arith.constant 0 : index
    %c144_112 = arith.constant 144 : index
    %137 = vector.load %arg8[%c2_110, %c0_111, %c144_112] : memref<3x4x160xf32, #tpu.memory_space<vmem>>, vector<1x4x16xf32>
    %138 = vector.shape_cast %137 : vector<1x4x16xf32> to vector<4x16xf32>
    %139 = vector.shape_cast %136 : vector<4x16xf32> to vector<1x4x16xf32>
    tpu.vector_store %arg8[%c2_110, %c0_111, %c144_112], %139 {strides = array<i32>} : memref<3x4x160xf32, #tpu.memory_space<vmem>>, vector<1x4x16xf32>,
    %cst = arith.constant 0.000000e+00 : f32
    %140 = vector.broadcast %cst : f32 to vector<8x128xf32>
    %c0_113 = arith.constant 0 : index
    %c0_114 = arith.constant 0 : index
    %c0_115 = arith.constant 0 : index
    %141 = vector.load %arg8[%c0_113, %c0_114, %c0_115] : memref<3x4x160xf32, #tpu.memory_space<vmem>>, vector<1x4x128xf32>
    %142 = vector.shape_cast %141 : vector<1x4x128xf32> to vector<4x128xf32>
    %c0_116 = arith.constant 0 : index
    %c0_117 = arith.constant 0 : index
    %c0_118 = arith.constant 0 : index
    %143 = vector.load %arg4[%c0_116, %c0_117, %c0_118] : memref<9x8x4xf32, #tpu.memory_space<vmem>>, vector<1x8x4xf32>
    %144 = vector.shape_cast %143 : vector<1x8x4xf32> to vector<8x4xf32>
    %cst_119 = arith.constant dense<0.000000e+00> : vector<8x128xf32>
    %145 = tpu.matmul %144, %142, %cst_119 {dimension_numbers = #tpu.dot_dimension_numbers<[1], [0], [0], [1], [0, 0, 1, 1], [], []>} : vector<8x4xf32>, vector<4x128xf32>, vector<8x128xf32> -> vector<8x128xf32>
    %146 = arith.addf %140, %145 : vector<8x128xf32>
    %c1_120 = arith.constant 1 : index
    %c0_121 = arith.constant 0 : index
    %c0_122 = arith.constant 0 : index
    %147 = vector.load %arg8[%c1_120, %c0_121, %c0_122] : memref<3x4x160xf32, #tpu.memory_space<vmem>>, vector<1x4x128xf32>
    %148 = vector.shape_cast %147 : vector<1x4x128xf32> to vector<4x128xf32>
    %c1_123 = arith.constant 1 : index
    %c0_124 = arith.constant 0 : index
    %c0_125 = arith.constant 0 : index
    %149 = vector.load %arg4[%c1_123, %c0_124, %c0_125] : memref<9x8x4xf32, #tpu.memory_space<vmem>>, vector<1x8x4xf32>
    %150 = vector.shape_cast %149 : vector<1x8x4xf32> to vector<8x4xf32>
    %cst_126 = arith.constant dense<0.000000e+00> : vector<8x128xf32>
    %151 = tpu.matmul %150, %148, %cst_126 {dimension_numbers = #tpu.dot_dimension_numbers<[1], [0], [0], [1], [0, 0, 1, 1], [], []>} : vector<8x4xf32>, vector<4x128xf32>, vector<8x128xf32> -> vector<8x128xf32>
    %152 = arith.addf %146, %151 : vector<8x128xf32>
    %c2_127 = arith.constant 2 : index
    %c0_128 = arith.constant 0 : index
    %c0_129 = arith.constant 0 : index
    %153 = vector.load %arg8[%c2_127, %c0_128, %c0_129] : memref<3x4x160xf32, #tpu.memory_space<vmem>>, vector<1x4x128xf32>
    %154 = vector.shape_cast %153 : vector<1x4x128xf32> to vector<4x128xf32>
    %c2_130 = arith.constant 2 : index
    %c0_131 = arith.constant 0 : index
    %c0_132 = arith.constant 0 : index
    %155 = vector.load %arg4[%c2_130, %c0_131, %c0_132] : memref<9x8x4xf32, #tpu.memory_space<vmem>>, vector<1x8x4xf32>
    %156 = vector.shape_cast %155 : vector<1x8x4xf32> to vector<8x4xf32>
    %cst_133 = arith.constant dense<0.000000e+00> : vector<8x128xf32>
    %157 = tpu.matmul %156, %154, %cst_133 {dimension_numbers = #tpu.dot_dimension_numbers<[1], [0], [0], [1], [0, 0, 1, 1], [], []>} : vector<8x4xf32>, vector<4x128xf32>, vector<8x128xf32> -> vector<8x128xf32>
    %158 = arith.addf %152, %157 : vector<8x128xf32>
    %c0_134 = arith.constant 0 : index
    %c0_135 = arith.constant 0 : index
    %c16_136 = arith.constant 16 : index
    %159 = vector.load %arg8[%c0_134, %c0_135, %c16_136] : memref<3x4x160xf32, #tpu.memory_space<vmem>>, vector<1x4x128xf32>
    %160 = vector.shape_cast %159 : vector<1x4x128xf32> to vector<4x128xf32>
    %c3_137 = arith.constant 3 : index
    %c0_138 = arith.constant 0 : index
    %c0_139 = arith.constant 0 : index
    %161 = vector.load %arg4[%c3_137, %c0_138, %c0_139] : memref<9x8x4xf32, #tpu.memory_space<vmem>>, vector<1x8x4xf32>
    %162 = vector.shape_cast %161 : vector<1x8x4xf32> to vector<8x4xf32>
    %cst_140 = arith.constant dense<0.000000e+00> : vector<8x128xf32>
    %163 = tpu.matmul %162, %160, %cst_140 {dimension_numbers = #tpu.dot_dimension_numbers<[1], [0], [0], [1], [0, 0, 1, 1], [], []>} : vector<8x4xf32>, vector<4x128xf32>, vector<8x128xf32> -> vector<8x128xf32>
    %164 = arith.addf %158, %163 : vector<8x128xf32>
    %c1_141 = arith.constant 1 : index
    %c0_142 = arith.constant 0 : index
    %c16_143 = arith.constant 16 : index
    %165 = vector.load %arg8[%c1_141, %c0_142, %c16_143] : memref<3x4x160xf32, #tpu.memory_space<vmem>>, vector<1x4x128xf32>
    %166 = vector.shape_cast %165 : vector<1x4x128xf32> to vector<4x128xf32>
    %c4_144 = arith.constant 4 : index
    %c0_145 = arith.constant 0 : index
    %c0_146 = arith.constant 0 : index
    %167 = vector.load %arg4[%c4_144, %c0_145, %c0_146] : memref<9x8x4xf32, #tpu.memory_space<vmem>>, vector<1x8x4xf32>
    %168 = vector.shape_cast %167 : vector<1x8x4xf32> to vector<8x4xf32>
    %cst_147 = arith.constant dense<0.000000e+00> : vector<8x128xf32>
    %169 = tpu.matmul %168, %166, %cst_147 {dimension_numbers = #tpu.dot_dimension_numbers<[1], [0], [0], [1], [0, 0, 1, 1], [], []>} : vector<8x4xf32>, vector<4x128xf32>, vector<8x128xf32> -> vector<8x128xf32>
    %170 = arith.addf %164, %169 : vector<8x128xf32>
    %c2_148 = arith.constant 2 : index
    %c0_149 = arith.constant 0 : index
    %c16_150 = arith.constant 16 : index
    %171 = vector.load %arg8[%c2_148, %c0_149, %c16_150] : memref<3x4x160xf32, #tpu.memory_space<vmem>>, vector<1x4x128xf32>
    %172 = vector.shape_cast %171 : vector<1x4x128xf32> to vector<4x128xf32>
    %c5_151 = arith.constant 5 : index
    %c0_152 = arith.constant 0 : index
    %c0_153 = arith.constant 0 : index
    %173 = vector.load %arg4[%c5_151, %c0_152, %c0_153] : memref<9x8x4xf32, #tpu.memory_space<vmem>>, vector<1x8x4xf32>
    %174 = vector.shape_cast %173 : vector<1x8x4xf32> to vector<8x4xf32>
    %cst_154 = arith.constant dense<0.000000e+00> : vector<8x128xf32>
    %175 = tpu.matmul %174, %172, %cst_154 {dimension_numbers = #tpu.dot_dimension_numbers<[1], [0], [0], [1], [0, 0, 1, 1], [], []>} : vector<8x4xf32>, vector<4x128xf32>, vector<8x128xf32> -> vector<8x128xf32>
    %176 = arith.addf %170, %175 : vector<8x128xf32>
    %c0_155 = arith.constant 0 : index
    %c0_156 = arith.constant 0 : index
    %c32_157 = arith.constant 32 : index
    %177 = vector.load %arg8[%c0_155, %c0_156, %c32_157] : memref<3x4x160xf32, #tpu.memory_space<vmem>>, vector<1x4x128xf32>
    %178 = vector.shape_cast %177 : vector<1x4x128xf32> to vector<4x128xf32>
    %c6_158 = arith.constant 6 : index
    %c0_159 = arith.constant 0 : index
    %c0_160 = arith.constant 0 : index
    %179 = vector.load %arg4[%c6_158, %c0_159, %c0_160] : memref<9x8x4xf32, #tpu.memory_space<vmem>>, vector<1x8x4xf32>
    %180 = vector.shape_cast %179 : vector<1x8x4xf32> to vector<8x4xf32>
    %cst_161 = arith.constant dense<0.000000e+00> : vector<8x128xf32>
    %181 = tpu.matmul %180, %178, %cst_161 {dimension_numbers = #tpu.dot_dimension_numbers<[1], [0], [0], [1], [0, 0, 1, 1], [], []>} : vector<8x4xf32>, vector<4x128xf32>, vector<8x128xf32> -> vector<8x128xf32>
    %182 = arith.addf %176, %181 : vector<8x128xf32>
    %c1_162 = arith.constant 1 : index
    %c0_163 = arith.constant 0 : index
    %c32_164 = arith.constant 32 : index
    %183 = vector.load %arg8[%c1_162, %c0_163, %c32_164] : memref<3x4x160xf32, #tpu.memory_space<vmem>>, vector<1x4x128xf32>
    %184 = vector.shape_cast %183 : vector<1x4x128xf32> to vector<4x128xf32>
    %c7_165 = arith.constant 7 : index
    %c0_166 = arith.constant 0 : index
    %c0_167 = arith.constant 0 : index
    %185 = vector.load %arg4[%c7_165, %c0_166, %c0_167] : memref<9x8x4xf32, #tpu.memory_space<vmem>>, vector<1x8x4xf32>
    %186 = vector.shape_cast %185 : vector<1x8x4xf32> to vector<8x4xf32>
    %cst_168 = arith.constant dense<0.000000e+00> : vector<8x128xf32>
    %187 = tpu.matmul %186, %184, %cst_168 {dimension_numbers = #tpu.dot_dimension_numbers<[1], [0], [0], [1], [0, 0, 1, 1], [], []>} : vector<8x4xf32>, vector<4x128xf32>, vector<8x128xf32> -> vector<8x128xf32>
    %188 = arith.addf %182, %187 : vector<8x128xf32>
    %c2_169 = arith.constant 2 : index
    %c0_170 = arith.constant 0 : index
    %c32_171 = arith.constant 32 : index
    %189 = vector.load %arg8[%c2_169, %c0_170, %c32_171] : memref<3x4x160xf32, #tpu.memory_space<vmem>>, vector<1x4x128xf32>
    %190 = vector.shape_cast %189 : vector<1x4x128xf32> to vector<4x128xf32>
    %c8 = arith.constant 8 : index
    %c0_172 = arith.constant 0 : index
    %c0_173 = arith.constant 0 : index
    %191 = vector.load %arg4[%c8, %c0_172, %c0_173] : memref<9x8x4xf32, #tpu.memory_space<vmem>>, vector<1x8x4xf32>
    %192 = vector.shape_cast %191 : vector<1x8x4xf32> to vector<8x4xf32>
    %cst_174 = arith.constant dense<0.000000e+00> : vector<8x128xf32>
    %193 = tpu.matmul %192, %190, %cst_174 {dimension_numbers = #tpu.dot_dimension_numbers<[1], [0], [0], [1], [0, 0, 1, 1], [], []>} : vector<8x4xf32>, vector<4x128xf32>, vector<8x128xf32> -> vector<8x128xf32>
    %194 = arith.addf %188, %193 : vector<8x128xf32>
    %c0_175 = arith.constant 0 : index
    %c0_176 = arith.constant 0 : index
    %c0_177 = arith.constant 0 : index
    %195 = vector.load %arg6[%c0_175, %c0_176, %c0_177] : memref<1x8x128xf32, #tpu.memory_space<vmem>>, vector<1x8x128xf32>
    %196 = vector.shape_cast %195 : vector<1x8x128xf32> to vector<8x128xf32>
    %197 = vector.shape_cast %194 : vector<8x128xf32> to vector<1x8x128xf32>
    tpu.vector_store %arg6[%c0_175, %c0_176, %c0_177], %197 {strides = array<i32>} : memref<1x8x128xf32, #tpu.memory_space<vmem>>, vector<1x8x128xf32>,
    %cst_178 = arith.constant dense<0.000000e+00> : vector<8xf32>
    %198 = vector.multi_reduction <add>, %194, %cst_178 [1] : vector<8x128xf32> to vector<8xf32>
    %199 = vector.shape_cast %198 : vector<8xf32> to vector<8x1xf32>
    %c0_179 = arith.constant 0 : index
    %c0_180 = arith.constant 0 : index
    %c0_181 = arith.constant 0 : index
    %c0_182 = arith.constant 0 : index
    %200 = vector.load %arg7[%c0_179, %c0_180, %c0_181, %c0_182] : memref<1x1x8x2xf32, #tpu.memory_space<vmem>>, vector<1x1x8x1xf32>
    %201 = vector.shape_cast %200 : vector<1x1x8x1xf32> to vector<8x1xf32>
    %202 = vector.shape_cast %199 : vector<8x1xf32> to vector<1x1x8x1xf32>
    tpu.vector_store %arg7[%c0_179, %c0_180, %c0_181, %c0_182], %202 {strides = array<i32>} : memref<1x1x8x2xf32, #tpu.memory_space<vmem>>, vector<1x1x8x1xf32>,
    %203 = arith.mulf %194, %194 : vector<8x128xf32>
    %cst_183 = arith.constant dense<0.000000e+00> : vector<8xf32>
    %204 = vector.multi_reduction <add>, %203, %cst_183 [1] : vector<8x128xf32> to vector<8xf32>
    %205 = vector.shape_cast %204 : vector<8xf32> to vector<8x1xf32>
    %c0_184 = arith.constant 0 : index
    %c0_185 = arith.constant 0 : index
    %c0_186 = arith.constant 0 : index
    %c1_187 = arith.constant 1 : index
    %206 = vector.load %arg7[%c0_184, %c0_185, %c0_186, %c1_187] : memref<1x1x8x2xf32, #tpu.memory_space<vmem>>, vector<1x1x8x1xf32>
    %207 = vector.shape_cast %206 : vector<1x1x8x1xf32> to vector<8x1xf32>
    %208 = vector.shape_cast %205 : vector<8x1xf32> to vector<1x1x8x1xf32>
    tpu.vector_store %arg7[%c0_184, %c0_185, %c0_186, %c1_187], %208 {strides = array<i32>} : memref<1x1x8x2xf32, #tpu.memory_space<vmem>>, vector<1x1x8x1xf32>,
    return
  }
  func.func @transform_0(%arg0: i32, %arg1: i32) -> (i32, i32, i32, i32) {
    %c0_i32 = arith.constant 0 : i32
    %c0_i32_0 = arith.constant 0 : i32
    %c0_i32_1 = arith.constant 0 : i32
    return %arg0, %c0_i32, %arg1, %c0_i32_0 : i32, i32, i32, i32
  }
  func.func @transform_1(%arg0: i32, %arg1: i32) -> (i32, i32, i32, i32) {
    %c1_i32 = arith.constant 1 : i32
    %0 = arith.addi %arg1, %c1_i32 : i32
    %c1_i32_0 = arith.constant 1 : i32
    %1 = arith.muli %0, %c1_i32_0 : i32
    %c0_i32 = arith.constant 0 : i32
    %c0_i32_1 = arith.constant 0 : i32
    %c0_i32_2 = arith.constant 0 : i32
    return %arg0, %c0_i32, %1, %c0_i32_1 : i32, i32, i32, i32
  }
  func.func @transform_2(%arg0: i32, %arg1: i32) -> (i32, i32, i32) {
    %c0_i32 = arith.constant 0 : i32
    %c0_i32_0 = arith.constant 0 : i32
    %c0_i32_1 = arith.constant 0 : i32
    %c0_i32_2 = arith.constant 0 : i32
    return %c0_i32, %c0_i32_0, %c0_i32_1 : i32, i32, i32
  }
  func.func @transform_3(%arg0: i32, %arg1: i32) -> (i32, i32) {
    %c0_i32 = arith.constant 0 : i32
    %c0_i32_0 = arith.constant 0 : i32
    %c0_i32_1 = arith.constant 0 : i32
    return %c0_i32, %c0_i32_0 : i32, i32
  }
  func.func @transform_4(%arg0: i32, %arg1: i32) -> (i32, i32, i32) {
    %c0_i32 = arith.constant 0 : i32
    %c0_i32_0 = arith.constant 0 : i32
    return %arg0, %c0_i32, %arg1 : i32, i32, i32
  }
  func.func @transform_5(%arg0: i32, %arg1: i32) -> (i32, i32, i32, i32) {
    %c0_i32 = arith.constant 0 : i32
    %c0_i32_0 = arith.constant 0 : i32
    %c0_i32_1 = arith.constant 0 : i32
    return %arg0, %arg1, %c0_i32, %c0_i32_0 : i32, i32, i32, i32
  }
}

module attributes {stable_mosaic.version = 11 : i64} {
  func.func @_bn_act_kernel(%arg0: i32, %arg1: i32, %arg2: memref<1x8x256xf32, #tpu.memory_space<vmem>>, %arg3: memref<8x2xf32, #tpu.memory_space<vmem>>, %arg4: memref<1x8x256xf32, #tpu.memory_space<vmem>>) attributes {dimension_semantics = [#tpu.dimension_semantics<parallel>, #tpu.dimension_semantics<parallel>], iteration_bounds = array<i64: 2, 1>, scalar_prefetch = 0 : i64, scratch_operands = 0 : i64, tpu.core_type = #tpu.core_type<tc>, window_params = [{transform_indices = @transform_0, window_bounds = array<i64: 1, 8, 256>}, {pipeline_mode = #tpu.pipeline_mode<synchronous>, transform_indices = @transform_1, window_bounds = array<i64: 8, 2>}, {transform_indices = @transform_2, window_bounds = array<i64: 1, 8, 256>}]} {
    %c0 = arith.constant 0 : index
    %c0_0 = arith.constant 0 : index
    %c0_1 = arith.constant 0 : index
    %0 = vector.load %arg2[%c0, %c0_0, %c0_1] : memref<1x8x256xf32, #tpu.memory_space<vmem>>, vector<1x8x256xf32>
    %1 = vector.shape_cast %0 : vector<1x8x256xf32> to vector<8x256xf32>
    %c0_2 = arith.constant 0 : index
    %c0_3 = arith.constant 0 : index
    %2 = vector.load %arg3[%c0_2, %c0_3] : memref<8x2xf32, #tpu.memory_space<vmem>>, vector<8x1xf32>
    %3 = vector.broadcast %2 : vector<8x1xf32> to vector<8x256xf32>
    %4 = arith.mulf %1, %3 : vector<8x256xf32>
    %c0_4 = arith.constant 0 : index
    %c1 = arith.constant 1 : index
    %5 = vector.load %arg3[%c0_4, %c1] : memref<8x2xf32, #tpu.memory_space<vmem>>, vector<8x1xf32>
    %6 = vector.broadcast %5 : vector<8x1xf32> to vector<8x256xf32>
    %7 = arith.addf %4, %6 : vector<8x256xf32>
    %cst = arith.constant 0.000000e+00 : f32
    %8 = vector.broadcast %cst : f32 to vector<8x256xf32>
    %9 = arith.maximumf %7, %8 : vector<8x256xf32>
    %c0_5 = arith.constant 0 : index
    %c0_6 = arith.constant 0 : index
    %c0_7 = arith.constant 0 : index
    %10 = vector.load %arg4[%c0_5, %c0_6, %c0_7] : memref<1x8x256xf32, #tpu.memory_space<vmem>>, vector<1x8x256xf32>
    %11 = vector.shape_cast %10 : vector<1x8x256xf32> to vector<8x256xf32>
    %12 = vector.shape_cast %9 : vector<8x256xf32> to vector<1x8x256xf32>
    tpu.vector_store %arg4[%c0_5, %c0_6, %c0_7], %12 {strides = array<i32>} : memref<1x8x256xf32, #tpu.memory_space<vmem>>, vector<1x8x256xf32>,
    return
  }
  func.func @transform_0(%arg0: i32, %arg1: i32) -> (i32, i32, i32) {
    %c0_i32 = arith.constant 0 : i32
    %c0_i32_0 = arith.constant 0 : i32
    return %arg0, %c0_i32, %arg1 : i32, i32, i32
  }
  func.func @transform_1(%arg0: i32, %arg1: i32) -> (i32, i32) {
    %c0_i32 = arith.constant 0 : i32
    %c0_i32_0 = arith.constant 0 : i32
    %c0_i32_1 = arith.constant 0 : i32
    return %c0_i32, %c0_i32_0 : i32, i32
  }
  func.func @transform_2(%arg0: i32, %arg1: i32) -> (i32, i32, i32) {
    %c0_i32 = arith.constant 0 : i32
    %c0_i32_0 = arith.constant 0 : i32
    return %arg0, %c0_i32, %arg1 : i32, i32, i32
  }
}

</mosaic_0001>

<bundles_post_ra>
// kernel: layer_forward.3
= control target key start
LH: loop header
LB: loop body
LE: loop exit
PB: predicated region body
PF: predicated region fallthrough
CT: control target
= control target key end

     0   :  { %s372_s9 = smov 0   ;;  %s374_s10 = smov 0   ;;  %s408_s0 = inlined_call_operand.vmem [shape: f32[2,8,256], index: 0, kind: input, shape index: {}, may-alias: {0,2}]   ;;  %s409_s1 = inlined_call_operand.vmem [shape: f32[8,2], index: 1, kind: input, shape index: {}]   ;;  %s410_s2 = inlined_call_operand.vmem [shape: f32[2,8,256], index: 2, kind: output, shape index: {}, may-alias: {0,2}]  }
   0x1   :  { %s376_s11 = smov 0  }
   0x2 LB: > { %s24_s12 = sadd.s32 1, %s349_s10  ;;  %p294_p0 = scmp.ge.s32.totalorder %s353_s11, 1  ;;  %s353_s11 = sphi %s376_s11, %s12_s11   ;;  %s349_s10 = sphi %s374_s10, %s412_s10   ;;  %s345_s9 = sphi %s372_s9, %s411_s9  }
   0x3   : > { %p26_p1 = scmp.ge.s32.totalorder %s24_s12, 2  ;;  %p133_p2 = scmp.lt.s32.totalorder %s353_s11, 3 }
   0x5   : > { %s414_s12 = smov (%p26_p1, %s24_s12), 0  ;;  %p134_p3 = pnand %p294_p0, %p133_p2 }
   0x6   : > { %p164_p4 = scmp.lt.s32.totalorder (!%p134_p3), %s345_s9, 1 }
   0x7   : > { %137 = sbr.rel (%p134_p3) target bundleno = 148 (0x94), region = 28 }
   0xc   : > { %v185_v0 = vld [vmem:[%s409_s1] sm:$0xff]  ;;  %v355_v1 = vmov 0   ;;  %v356_v2 = vmov 1   ;;  %s416_s9 = smov (!%p164_p4, %s345_s9), 1 }
   0xd   : > { %329 = vset.pattern.permute.xlu0 %v355_v1  ;;  %s301_s15 = sshll.u32 %s416_s9, 4 }
   0xe   : > { %188 = vperm.xlu0 %329, %v185_v0   ;;  %s171_s18 = scalar_lea.vmem %s408_s0, %s301_s15  ;;  %s181_s21 = scalar_lea.vmem %s410_s2, %s301_s15 }
   0xf   : > { %v183_v4 = vld [vmem:[%s171_s18] sm:$0xff]  ;;  %v184_v5 = vld [vmem:[%s171_s18 + $0x8] sm:$0xff] }
  0x12   : > { %330 = vset.pattern.permute.xlu0 %v356_v2 }
  0x13   : > { %194 = vperm.xlu0 %330, %v185_v0  }
  0x89   : > { %v189_v3 = vpop.permute.xlu0 %188 }
  0x8a   : > { %v191_v6 = vmul.f32 %v189_v3, %v183_v4  ;;  %v192_v7 = vmul.f32 %v189_v3, %v184_v5 }
  0x8e   : > { %v195_v8 = vpop.permute.xlu0 %194 }
  0x8f   : > { %v197_v9 = vadd.f32 %v195_v8, %v191_v6  ;;  %v198_v10 = vadd.f32 %v195_v8, %v192_v7 }
  0x91   : > { %v199_v11 = vmax.f32 %v197_v9, 0.0  ;;  %v200_v12 = vmax.f32 %v198_v10, 0.0 }
  0x93   : > { %201 = vst [vmem:[%s181_s21] sm:$0xff] %v199_v11  ;;  %202 = vst [vmem:[%s181_s21 + $0x8] sm:$0xff] %v200_v12 }
  0x94 PF: > { %s12_s11 = sadd.s32 1, %s353_s11   ;;  %s411_s9 = smov %s349_s10 }
  0x95   : > { %p9_p5 = scmp.ge.s32.totalorder %s12_s11, 4   ;;  %s412_s10 = smov %s414_s12 }
  0x97   :  { %11 = sbr.rel (!%p9_p5) target bundleno = 2 (0x2), region = 58 }

// kernel: layer_forward.2
= control target key start
LH: loop header
LB: loop body
LE: loop exit
PB: predicated region body
PF: predicated region fallthrough
CT: control target
= control target key end

     0   :  { %s1955_s18 = smov 0   ;;  %s1957_s19 = smov 0   ;;  %s2351_s0 = inlined_call_operand.vmem [shape: f32[2,4,24,18], index: 0, kind: input, shape index: {}, may-alias: {0,1}]   ;;  %s2352_s1 = inlined_call_operand.vmem [shape: f32[2,4,24,18], index: 1, kind: input, shape index: {}, may-alias: {0,1}]   ;;  %s2353_s2 = inlined_call_operand.vmem [shape: f32[9,8,4], index: 2, kind: input, shape index: {}]   ;;  %s2354_s3 = inlined_call_operand.vmem [shape: f32[8,1], index: 3, kind: input, shape index: {}]   ;;  %s2355_s4 = inlined_call_operand.vmem [shape: f32[2,8,256], index: 4, kind: output, shape index: {0}]   ;;  %s2356_s5 = inlined_call_operand.vmem [shape: f32[2,2,8,2], index: 5, kind: output, shape index: {1}]  }
   0x1   :  { %s1959_s20 = smov 0   ;;  %s1961_s21 = smov 0  }
   0x2   :  { %s1963_s22 = smov 0   ;;  %s1965_s23 = smov 0  }
   0x3   :  { %s1967_s24 = smov 0   ;;  %s1969_s3 = smov 0  }
   0x4   :  { %s1971_s25 = smov 0  }
   0x5 LB: > { %s25_s26 = sadd.s32 1, %s1890_s24  ;;  %s28_s27 = sadd.s32 1, %s1894_s3  ;;  %s1898_s25 = sphi %s1971_s25, %s16_s25   ;;  %s1894_s3 = sphi %s1969_s3, %s2366_s3   ;;  %s1890_s24 = sphi %s1967_s24, %s2365_s24   ;;  %s1886_s23 = sphi %s1965_s23, %s2364_s23   ;;  %s1882_s22 = sphi %s1963_s22, %s2363_s22   ;;  %s1878_s21 = sphi %s1961_s21, %s2362_s21   ;;  %s1874_s20 = sphi %s1959_s20, %s2361_s20   ;;  %s1870_s19 = sphi %s1957_s19, %s2360_s19   ;;  %s1866_s18 = sphi %s1955_s18, %s2359_s18  }
   0x6   : > { %p26_p0 = scmp.ge.s32.totalorder %s25_s26, 2  ;;  %p44_p1 = scmp.ne.s32.totalorder %s1878_s21, %s1874_s20 }
   0x7   : > { %p45_p2 = scmp.eq.s32.totalorder %s1898_s25, 0  ;;  %s37_s8 = sadd.s32 1, %s1878_s21 }
   0x8   : > { %s2005_s28 = scalar_select %p26_p0, 0, %s25_s26  }
   0x9   : > { %s2368_s27 = smov (!%p26_p0, %s28_s27), %s1894_s3  ;;  %p2010_p3 = por %p45_p2, %p44_p1 }
   0xa   : > { %p30_p4 = scmp.ge.s32.totalorder %s2368_s27, 2  ;;  %s61_s30 = sadd.s32 1, %s2005_s28 }
   0xb   : > { %s33_s6 = ssub.s32 %s1890_s24, %s2005_s28  ;;  %s63_s7 = ssub.s32 %s25_s26, %s61_s30 }
   0xc   : > { %s2370_s27 = smov (%p30_p4, %s2368_s27), 0  ;;  %p74_p5 = scmp.ne.s32.totalorder %s1870_s19, %s1866_s18 }
   0xd   : > { %s32_s9 = ssub.s32 %s1894_s3, %s2370_s27  ;;  %s67_s10 = sadd.s32 1, %s1870_s19 }
   0xe   : > { %s34_s11 = sor.u32 %s33_s6, %s32_s9  ;;  %s64_s12 = sor.u32 %s63_s7, %s32_s9 }
   0xf   : > { %p35_p6 = scmp.eq.s32.totalorder %s34_s11, 0  ;;  %p65_p7 = scmp.eq.s32.totalorder %s64_s12, 0 }
  0x10   : > { %p2027_p8 = por %p74_p5, %p45_p2  ;;  %p1620_p9 = scmp.ge.s32.totalorder %s1898_s25, 4 }
  0x11   : > { %s2032_s14 = scalar_select %p35_p6, %s1878_s21, %s37_s8  }
  0x12   : > { %s2035_s15 = scalar_select %p65_p7, %s1870_s19, %s67_s10  }
  0x13   : > { %204 = sbr.rel (%p1620_p9) target bundleno = 42 (0x2a), region = 24 }
  0x18   : > { %207 = sbr.rel (!%p2010_p3) target bundleno = 33 (0x21), region = 28  ;;  %s209_s16 = sand.u32 (%p2010_p3), 1, %s1878_s21  }
  0x19   : > { %s1727_s17 = smul.u32 (%p2010_p3), 12, %s1894_s3  ;;  %s1621_s26 = sshll.u32 (%p2010_p3), %s209_s16, 5 }
  0x1a   : > { %s211_s10 = scalar_lea.vmem (%p2010_p3), [#allocation3], %s1621_s26 }
  0x1b   : > { %s213_s30 = sadd.s32 (%p2010_p3), %s1890_s24, %s1727_s17 }
  0x1c   : > { %s1622_s6 = sshll.u32 (%p2010_p3), %s213_s30, 3 }
  0x1d   : > { %s215_s8 = scalar_lea.vmem %s2351_s0, %s1622_s6 }
  0x1e   : > { %v250_v0 = vld [vmem:[%s215_s8] sm:$0xff]  ;;  %v252_v1 = vld [vmem:[%s215_s8 + $0x18] sm:$0xff]  ;;  %v254_v2 = vld [vmem:[%s215_s8 + $0x30] sm:$0xff] }
  0x1f   : > { %251 = vst [vmem:[%s211_s10] sm:$0xff] %v250_v0  ;;  %253 = vst [vmem:[%s211_s10 + $0x8] sm:$0xff] %v252_v1  ;;  %v256_v3 = vld [vmem:[%s215_s8 + $0x48] sm:$0xff] }
  0x20   : > { %255 = vst [vmem:[%s211_s10 + $0x10] sm:$0xff] %v254_v2  ;;  %257 = vst [vmem:[%s211_s10 + $0x18] sm:$0xff] %v256_v3 }
  0x21 PF: > { %263 = sbr.rel (!%p2027_p8) target bundleno = 42 (0x2a), region = 66  ;;  %s265_s29 = sand.u32 (%p2027_p8), 1, %s1870_s19  }
  0x22   : > { %s1518_s11 = smul.u32 (%p2027_p8), 12, %s1894_s3  ;;  %s1623_s12 = sshll.u32 (%p2027_p8), %s265_s29, 5 }
  0x23   : > { %s267_s7 = scalar_lea.vmem (%p2027_p8), [#allocation4], %s1623_s12 }
  0x24   : > { %s1519_s16 = sadd.s32 (%p2027_p8), %s1890_s24, %s1518_s11 }
  0x25   : > { %s1624_s17 = sshll.u32 (%p2027_p8), %s1519_s16, 3 }
  0x26   : > { %s1521_s26 = scalar_lea.vmem %s2352_s1, %s1624_s17 }
  0x27   : > { %v1625_v4 = vld [vmem:[%s1521_s26 + $0x8] sm:$0xff]  ;;  %v1626_v5 = vld [vmem:[%s1521_s26 + $0x20] sm:$0xff]  ;;  %v1627_v6 = vld [vmem:[%s1521_s26 + $0x38] sm:$0xff] }
  0x28   : > { %308 = vst [vmem:[%s267_s7] sm:$0xff] %v1625_v4  ;;  %310 = vst [vmem:[%s267_s7 + $0x8] sm:$0xff] %v1626_v5  ;;  %v1628_v7 = vld [vmem:[%s1521_s26 + $0x50] sm:$0xff] }
  0x29   : > { %312 = vst [vmem:[%s267_s7 + $0x10] sm:$0xff] %v1627_v6  ;;  %314 = vst [vmem:[%s267_s7 + $0x18] sm:$0xff] %v1628_v7 }
  0x2a PF: > { %p1629_p10 = scmp.ge.s32.totalorder %s1898_s25, 1  ;;  %p319_p11 = scmp.lt.s32.totalorder %s1898_s25, 5 }
  0x2c   : > { %p320_p12 = pnand %p1629_p10, %p319_p11 }
  0x2d   : > { %s326_s13 = sand.u32 (!%p320_p12), 1, %s1874_s20   ;;  %s1900_s20 = smov (!%p320_p12), 32  }
  0x2e   : > { %323 = sbr.rel (%p320_p12) target bundleno = 702 (0x2be), region = 104  ;;  %s1630_s9 = sshll.u32 (!%p320_p12), %s326_s13, 5 }
  0x2f   : > { %s2057_s8 = scalar_lea.vmem (!%p320_p12), [#allocation3], %s1630_s9  ;;  %s1901_s10 = smov (!%p320_p12), 16  }
  0x30   : > { %s1902_s29 = smov (!%p320_p12), 15   ;;  %s1903_s11 = smov (!%p320_p12), 127  }
  0x31   : > { %s333_s12 = sand.u32 (!%p320_p12), 1, %s1866_s18   ;;  %s1904_s16 = smov (!%p320_p12), 126  }
  0x32   : > { %s1631_s17 = sshll.u32 (!%p320_p12), %s333_s12, 5  ;;  %s1905_s30 = smov (!%p320_p12), 48  }
  0x33   : > { %vm401_vm0 = vcmask 1041409   ;;  %vm403_vm1 = vcmask 1045509   ;;  %vm406_vm2 = vcmask 1042434   ;;  %vm408_vm3 = vcmask 1046534   ;;  %v458_v8 = vld [vmem:[%s2057_s8 + $0x2] sm:$0x1] }
  0x34   : > { %v459_v9 = vld [vmem:[%s2057_s8 + $0xa] sm:$0x1]  ;;  %v460_v10 = vld [vmem:[%s2057_s8 + $0x12] sm:$0x1]  ;;  %v461_v11 = vld [vmem:[%s2057_s8 + $0x1a] sm:$0x1] }
  0x35   : > { %v466_v12 = vrot.slane %v459_v9, 7  ;;  %v469_v13 = vrot.slane %v460_v10, 6  ;;  %v428_v14 = vld [vmem:[%s2057_s8 + $0x1] sm:$0x1]  ;;  %vm411_vm4 = vcmask 1043459   ;;  %v472_v15 = vrot.slane %v461_v11, 5 }
  0x36   : > { %v429_v16 = vld [vmem:[%s2057_s8 + $0x9] sm:$0x1]  ;;  %v430_v17 = vld [vmem:[%s2057_s8 + $0x11] sm:$0x1]  ;;  %v431_v19 = vld [vmem:[%s2057_s8 + $0x19] sm:$0x1] }
  0x37   : > { %v467_v18 = vsel %vm401_vm0, %v466_v12, %v458_v8  ;;  %v436_v20 = vrot.slane %v429_v16, 7  ;;  %v439_v21 = vrot.slane %v430_v17, 6  ;;  %v392_v22 = vld [vmem:[%s2057_s8] sm:$0x1]  ;;  %vm413_vm5 = vcmask 1047559   ;;  %s2141_s18 = scalar_lea.vmem [#allocation4], %s1631_s17 }
  0x38   : > { %v468_v23 = vsel %vm403_vm1, %v466_v12, %v467_v18  ;;  %v442_v24 = vrot.slane %v431_v19, 5  ;;  %v393_v25 = vld [vmem:[%s2057_s8 + $0x8] sm:$0x1]  ;;  %v394_v26 = vld [vmem:[%s2057_s8 + $0x10] sm:$0x1]  ;;  %vm416_vm6 = vcmask 125952  }
  0x39   : > { %v470_v27 = vsel %vm406_vm2, %v469_v13, %v468_v23  ;;  %v437_v28 = vsel %vm401_vm0, %v436_v20, %v428_v14  ;;  %v395_v29 = vld [vmem:[%s2057_s8 + $0x18] sm:$0x1]  ;;  %v400_v30 = vrot.slane %v393_v25, 7  ;;  %v405_v31 = vrot.slane %v394_v26, 6  ;;  %v488_v32 = vld [vmem:[%s2057_s8 + $0x3] sm:$0x1] }
  0x3a   : > { %v471_v33 = vsel %vm408_vm3, %v469_v13, %v470_v27  ;;  %v438_v34 = vsel %vm403_vm1, %v436_v20, %v437_v28  ;;  %v410_v35 = vrot.slane %v395_v29, 5  ;;  %v489_v36 = vld [vmem:[%s2057_s8 + $0xb] sm:$0x1]  ;;  %v490_v37 = vld [vmem:[%s2057_s8 + $0x13] sm:$0x1]  ;;  %s1906_s6 = smov 64  }
  0x3b   : > { %v473_v38 = vsel %vm411_vm4, %v472_v15, %v471_v33  ;;  %v440_v39 = vsel %vm406_vm2, %v439_v21, %v438_v34  ;;  %v402_v40 = vsel %vm401_vm0, %v400_v30, %v392_v22  ;;  %v491_v41 = vld [vmem:[%s2057_s8 + $0x1b] sm:$0x1]  ;;  %v496_v42 = vrot.slane %v489_v36, 7  ;;  %v519_v47 = vld [vmem:[%s2057_s8 + $0xc] sm:$0x1]  ;;  %s1907_s26 = smov 31  }
  0x3c   : > { %v2085_v43 = vsel %vm413_vm5, %v472_v15, %v473_v38  ;;  %v441_v44 = vsel %vm408_vm3, %v439_v21, %v440_v39  ;;  %v404_v45 = vsel %vm403_vm1, %v400_v30, %v402_v40  ;;  %v499_v46 = vrot.slane %v490_v37, 6  ;;  %v520_v48 = vld [vmem:[%s2057_s8 + $0x14] sm:$0x1]  ;;  %v518_v53 = vld [vmem:[%s2057_s8 + $0x4] sm:$0x1]  ;;  %s1908_s7 = smov 47  }
  0x3d   : > { %475 = vrot.lane.b32.xlu1 %v2085_v43, %s1900_s20  ;;  %v443_v49 = vsel %vm411_vm4, %v442_v24, %v441_v44  ;;  %v407_v50 = vsel %vm406_vm2, %v405_v31, %v404_v45  ;;  %v497_v51 = vsel %vm401_vm0, %v496_v42, %v488_v32  ;;  %v502_v52 = vrot.slane %v491_v41, 5  ;;  %v521_v54 = vld [vmem:[%s2057_s8 + $0x1c] sm:$0x1]  ;;  %v549_v59 = vld [vmem:[%s2057_s8 + $0xd] sm:$0x1]  ;;  %s1909_s13 = smov 14  }
  0x3e   : > { %v2098_v55 = vsel %vm413_vm5, %v442_v24, %v443_v49  ;;  %v409_v56 = vsel %vm408_vm3, %v405_v31, %v407_v50  ;;  %v498_v57 = vsel %vm403_vm1, %v496_v42, %v497_v51  ;;  %v526_v58 = vrot.slane %v519_v47, 7  ;;  %v548_v0 = vld [vmem:[%s2057_s8 + $0x5] sm:$0x1]  ;;  %v550_v4 = vld [vmem:[%s2057_s8 + $0x15] sm:$0x1]  ;;  %s1910_s9 = smov 30  }
  0x3f   : > { %445 = vrot.lane.b32.xlu0 %v2098_v55, %s1901_s10  ;;  %v412_v60 = vsel %vm411_vm4, %v410_v35, %v409_v56  ;;  %v500_v61 = vsel %vm406_vm2, %v499_v46, %v498_v57  ;;  %v529_v62 = vrot.slane %v520_v48, 6  ;;  %v532_v63 = vrot.slane %v521_v54, 5  ;;  %v579_v6 = vld [vmem:[%s2057_s8 + $0xe] sm:$0x1]  ;;  %v578_v9 = vld [vmem:[%s2057_s8 + $0x6] sm:$0x1] }
  0x40   : > { %v414_v1 = vsel %vm413_vm5, %v410_v35, %v412_v60  ;;  %v501_v2 = vsel %vm408_vm3, %v499_v46, %v500_v61  ;;  %v527_v3 = vsel %vm401_vm0, %v526_v58, %v518_v53  ;;  %v556_v5 = vrot.slane %v549_v59, 7  ;;  %v580_v12 = vld [vmem:[%s2057_s8 + $0x16] sm:$0x1]  ;;  %v551_v18 = vld [vmem:[%s2057_s8 + $0x1d] sm:$0x1]  ;;  %s1911_s20 = smov 80  }
  0x41   : > { %450 = vrot.lane.b32.xlu1 %v2098_v55, %s1902_s29  ;;  %v503_v7 = vsel %vm411_vm4, %v502_v52, %v501_v2  ;;  %v528_v8 = vsel %vm403_vm1, %v526_v58, %v527_v3  ;;  %417 = vst.msk [vmem:[#allocation2] sm:$0xf] %vm416_vm6, %v414_v1  ;;  %v586_v13 = vrot.slane %v579_v6, 7  ;;  %v559_v15 = vrot.slane %v550_v4, 6  ;;  %v609_v22 = vld [vmem:[%s2057_s8 + $0xf] sm:$0x1] }
  0x42   : > { %v530_v10 = vsel %vm406_vm2, %v529_v62, %v528_v8  ;;  %v557_v11 = vsel %vm401_vm0, %v556_v5, %v548_v0  ;;  %v2125_v16 = vsel %vm413_vm5, %v502_v52, %v503_v7  ;;  %v589_v21 = vrot.slane %v580_v12, 6  ;;  %v581_v27 = vld [vmem:[%s2057_s8 + $0x1e] sm:$0x1]  ;;  %v666_v28 = vld [vmem:[%s2141_s18 + $0x9] sm:$0x1]  ;;  %s1912_s12 = smov 96  }
  0x43   : > { %418 = vrot.lane.b32.xlu0 %v414_v1, %s1903_s11  ;;  %v531_v14 = vsel %vm408_vm3, %v529_v62, %v530_v10  ;;  %v558_v19 = vsel %vm403_vm1, %v556_v5, %v557_v11  ;;  %v587_v20 = vsel %vm401_vm0, %v586_v13, %v578_v9  ;;  %v562_v26 = vrot.slane %v551_v18, 5  ;;  %v665_v29 = vld [vmem:[%s2141_s18 + $0x1] sm:$0x1]  ;;  %v608_v31 = vld [vmem:[%s2057_s8 + $0x7] sm:$0x1]  ;;  %s1913_s17 = smov 63  }
  0x44   : > { %v533_v17 = vsel %vm411_vm4, %v532_v63, %v531_v14  ;;  %v588_v24 = vsel %vm403_vm1, %v586_v13, %v587_v20  ;;  %v560_v25 = vsel %vm406_vm2, %v559_v15, %v558_v19  ;;  %v673_v30 = vrot.slane %v666_v28, 7  ;;  %v667_v34 = vld [vmem:[%s2141_s18 + $0x11] sm:$0x1]  ;;  %v638_v35 = vld [vmem:[%s2141_s18] sm:$0x1]  ;;  %p376_p13 = scmp.lt.s32.totalorder %s1886_s23, 1 }
  0x45   : > { %423 = vrot.lane.b32.xlu1 %v414_v1, %s1904_s16  ;;  %v2135_v23 = vsel %vm413_vm5, %v532_v63, %v533_v17  ;;  %v616_v32 = vrot.slane %v609_v22, 7  ;;  %v590_v33 = vsel %vm406_vm2, %v589_v21, %v588_v24  ;;  %v639_v36 = vld [vmem:[%s2141_s18 + $0x8] sm:$0x1]  ;;  %v561_v37 = vsel %vm408_vm3, %v559_v15, %v560_v25  ;;  %v640_v38 = vld [vmem:[%s2141_s18 + $0x10] sm:$0x1]  ;;  %p378_p0 = scmp.lt.s32.totalorder %s1882_s22, 1 }
  0x46   : > { %v641_v39 = vld [vmem:[%s2141_s18 + $0x18] sm:$0x1]  ;;  %v646_v40 = vrot.slane %v639_v36, 7  ;;  %v592_v41 = vrot.slane %v581_v27, 5  ;;  %v674_v42 = vsel %vm401_vm0, %v673_v30, %v665_v29  ;;  %v649_v44 = vrot.slane %v640_v38, 6  ;;  %s2372_s23 = smov (!%p376_p13, %s1886_s23), 1 }
  0x47   : > { %505 = vrot.lane.b32.xlu0 %v2125_v16, %s1905_s30  ;;  %v591_v45 = vsel %vm408_vm3, %v589_v21, %v590_v33  ;;  %v610_v46 = vld [vmem:[%s2057_s8 + $0x17] sm:$0x1]  ;;  %v652_v48 = vrot.slane %v641_v39, 5  ;;  %v563_v49 = vsel %vm411_vm4, %v562_v26, %v561_v37  ;;  %v676_v50 = vrot.slane %v667_v34, 6  ;;  %v668_v60 = vld [vmem:[%s2141_s18 + $0x19] sm:$0x1] }
  0x48   : > { %v647_v47 = vsel %vm401_vm0, %v646_v40, %v638_v35  ;;  %v617_v51 = vsel %vm401_vm0, %v616_v32, %v608_v31  ;;  %v675_v53 = vsel %vm403_vm1, %v673_v30, %v674_v42  ;;  %v593_v56 = vsel %vm411_vm4, %v592_v41, %v591_v45  ;;  %v611_v1 = vld [vmem:[%s2057_s8 + $0x1f] sm:$0x1]  ;;  %s1915_s8 = smov 79   ;;  %s1916_s30 = smov 46   ;;  %v1636_v42 = vld [vmem:[%s2353_s2 + $0x8] sm:$0xff] }
  0x49   : > { %535 = vrot.lane.b32.xlu1 %v2135_v23, %s1906_s6  ;;  %v648_v52 = vsel %vm403_vm1, %v646_v40, %v647_v47  ;;  %v619_v57 = vrot.slane %v610_v46, 6  ;;  %v564_v59 = vsel %vm413_vm5, %v562_v26, %v563_v49  ;;  %v618_v61 = vsel %vm403_vm1, %v616_v32, %v617_v51  ;;  %s1917_s18 = smov 112   ;;  %s1918_s6 = smov 95   ;;  %v695_v32 = vld [vmem:[%s2353_s2] sm:$0xff] }
  0x4a   : > { %v650_v54 = vsel %vm406_vm2, %v649_v44, %v648_v52  ;;  %v677_v63 = vsel %vm406_vm2, %v676_v50, %v675_v53  ;;  %v679_v2 = vrot.slane %v668_v60, 5  ;;  %v1914_v7 = vmov 0.0   ;;  %s2374_s22 = smov (!%p378_p0, %s1882_s22), 1 }
  0x4b   : > { %480 = vrot.lane.b32.xlu0 %v2085_v43, %s1907_s26  ;;  %v651_v58 = vsel %vm408_vm3, %v649_v44, %v650_v54  ;;  %v620_v3 = vsel %vm406_vm2, %v619_v57, %v618_v61  ;;  %v678_v4 = vsel %vm408_vm3, %v676_v50, %v677_v63  ;;  %1687 = vmatprep.subr.mxu1 %v1914_v7  ;;  %s1919_s26 = smov 62   ;;  %vm1921_vm7 = vmmov 0   ;;  %v1644_v54 = vld [vmem:[%s2353_s2 + $0x18] sm:$0xff]  ;;  %v1647_v61 = vld [vmem:[%s2353_s2 + $0x20] sm:$0xff] }
  0x4c   : > { %v653_v62 = vsel %vm411_vm4, %v652_v48, %v651_v58  ;;  %v621_v5 = vsel %vm408_vm3, %v619_v57, %v620_v3  ;;  %v680_v6 = vsel %vm411_vm4, %v679_v2, %v678_v4  ;;  %1682 = vmatprep.subr.mxu0 %v1914_v7  ;;  %1684 = vmatprep.mubr.msk.f32.mxu0 %vm1921_vm7, %v1914_v7  ;;  %vm448_vm8 = vcmask 257152  }
  0x4d   : > { %510 = vrot.lane.b32.xlu1 %v2125_v16, %s1908_s7  ;;  %v654_v0 = vsel %vm413_vm5, %v652_v48, %v653_v62  ;;  %v681_v9 = vsel %vm413_vm5, %v679_v2, %v680_v6  ;;  %s1920_s7 = smov 78   ;;  %1689 = vmatprep.mubr.msk.f32.mxu1 %vm1921_vm7, %v1914_v7  ;;  %vm478_vm9 = vcmask 388352   ;;  %vm508_vm10 = vcmask 519552   ;;  %v1641_v48 = vld [vmem:[%s2353_s2 + $0x10] sm:$0xff]  ;;  %v1650_v2 = vld [vmem:[%s2353_s2 + $0x28] sm:$0xff] }
  0x4e   : > { %656 = vst.msk [vmem:[#allocation2 + $0x4] sm:$0xf] %vm416_vm6, %v654_v0  ;;  %vm538_vm11 = vcmask 650752   ;;  %vm568_vm12 = vcmask 781952   ;;  %vm598_vm13 = vcmask 913152   ;;  %vm628_vm14 = vcmask 1044352  }
  0x4f   : > { %454 = vrot.lane.b32.xlu0 %v2098_v55, %s1909_s13  ;;  %v594_v55 = vsel %vm413_vm5, %v592_v41, %v593_v56  ;;  %vm703_vm15 = vcmask 1043456   ;;  %vm699_vm0 = vcmask 31744   ;;  %vm942_vm1 = vcmask 916480  }
  0x50   : > { %vm1201_vm2 = vcmask 785408   ;;  %vm1454_vm3 = vcmask 7168  }
  0x51   : > { %484 = vrot.lane.b32.xlu1 %v2085_v43, %s1910_s9  ;;  %v622_v43 = vrot.slane %v611_v1, 5  ;;  %s1923_s9 = smov 94  }
  0x53   : > { %565 = vrot.lane.b32.xlu0 %v564_v59, %s1911_s20  ;;  %v623_v8 = vsel %vm411_vm4, %v622_v43, %v621_v5  ;;  %s1924_s20 = smov 110   ;;  %v1656_v5 = vld [vmem:[%s2353_s2 + $0x38] sm:$0xff]  ;;  %vm1459_vm4 = vcmask 15368  }
  0x54   : > { %v624_v10 = vsel %vm413_vm5, %v622_v43, %v623_v8 }
  0x55   : > { %595 = vrot.lane.b32.xlu1 %v594_v55, %s1912_s12 }
  0x57   : > { %540 = vrot.lane.b32.xlu0 %v2135_v23, %s1913_s17 }
  0x59   : > { %570 = vrot.lane.b32.xlu1 %v564_v59, %s1915_s8 }
  0x5b   : > { %514 = vrot.lane.b32.xlu0 %v2125_v16, %s1916_s30 }
  0x5d   : > { %682 = vrot.lane.b32.xlu1 %v681_v9, %s1901_s10  ;;  %s1922_s10 = smov 111  }
  0x5f   : > { %625 = vrot.lane.b32.xlu0 %v624_v10, %s1917_s18 }
  0x61   : > { %600 = vrot.lane.b32.xlu1 %v594_v55, %s1918_s6 }
  0x63   : > { %544 = vrot.lane.b32.xlu0 %v2135_v23, %s1919_s26 }
  0x65   : > { %574 = vrot.lane.b32.xlu1 %v564_v59, %s1920_s7 }
  0x67   : > { %657 = vrot.lane.b32.xlu0 %v654_v0, %s1903_s11 }
  0x69   : > { %686 = vrot.lane.b32.xlu1 %v681_v9, %s1902_s29 }
  0x6b   : > { %630 = vrot.lane.b32.xlu0 %v624_v10, %s1922_s10 }
  0x6d   : > { %661 = vrot.lane.b32.xlu1 %v654_v0, %s1904_s16  ;;  %v1653_v0 = vld [vmem:[%s2353_s2 + $0x30] sm:$0xff] }
  0x6f   : > { %604 = vrot.lane.b32.xlu0 %v594_v55, %s1923_s9 }
  0x71   : > { %690 = vrot.lane.b32.xlu1 %v681_v9, %s1909_s13  ;;  %s1632_s13 = sshll.u32 %s2372_s23, 1 }
  0x72   : > { %s381_s17 = sadd.s32 %s1632_s13, %s2374_s22 }
  0x73   : > { %634 = vrot.lane.b32.xlu0 %v624_v10, %s1924_s20  ;;  %v1659_v10 = vld [vmem:[%s2353_s2 + $0x40] sm:$0xff]  ;;  %s1633_s8 = sshll.u32 %s381_s17, 3 }
  0x74   : > { %s391_s22 = scalar_lea.vmem %s2356_s5, %s1633_s8 }
  0xaf   : > { %v476_v11 = vpop.permute.xlu1 %475 }
  0xb1   : > { %v446_v12 = vpop.permute.xlu0 %445 }
  0xb2   : > { %449 = vst.msk [vmem:[#allocation2] sm:$0xf] %vm448_vm8, %v446_v12 }
  0xb3   : > { %v451_v13 = vpop.permute.xlu1 %450  ;;  %479 = vst.msk [vmem:[#allocation2] sm:$0xf] %vm478_vm9, %v476_v11 }
  0xb5   : > { %v419_v14 = vpop.permute.xlu0 %418 }
  0xb6   : > { %422 = vst.msk [vmem:[#allocation2 + $0x8] sm:$0xf] %vm416_vm6, %v419_v14 }
  0xb7   : > { %453 = vst.msk [vmem:[#allocation2 + $0x8] sm:$0xf] %vm448_vm8, %v451_v13  ;;  %v424_v15 = vpop.permute.xlu1 %423 }
  0xb8   : > { %427 = vst.msk [vmem:[#allocation2 + $0x10] sm:$0xf] %vm416_vm6, %v424_v15 }
  0xb9   : > { %v506_v16 = vpop.permute.xlu0 %505 }
  0xba   : > { %509 = vst.msk [vmem:[#allocation2] sm:$0xf] %vm508_vm10, %v506_v16 }
  0xbb   : > { %v536_v17 = vpop.permute.xlu1 %535 }
  0xbc   : > { %539 = vst.msk [vmem:[#allocation2] sm:$0xf] %vm538_vm11, %v536_v17 }
  0xbd   : > { %v481_v18 = vpop.permute.xlu0 %480 }
  0xbe   : > { %483 = vst.msk [vmem:[#allocation2 + $0x8] sm:$0xf] %vm478_vm9, %v481_v18 }
  0xbf   : > { %v511_v19 = vpop.permute.xlu1 %510 }
  0xc0   : > { %513 = vst.msk [vmem:[#allocation2 + $0x8] sm:$0xf] %vm508_vm10, %v511_v19 }
  0xc1   : > { %v455_v20 = vpop.permute.xlu0 %454 }
  0xc2   : > { %457 = vst.msk [vmem:[#allocation2 + $0x10] sm:$0xf] %vm448_vm8, %v455_v20 }
  0xc3   : > { %v485_v21 = vpop.permute.xlu1 %484 }
  0xc4   : > { %487 = vst.msk [vmem:[#allocation2 + $0x10] sm:$0xf] %vm478_vm9, %v485_v21 }
  0xc5   : > { %v566_v22 = vpop.permute.xlu0 %565 }
  0xc6   : > { %569 = vst.msk [vmem:[#allocation2] sm:$0xf] %vm568_vm12, %v566_v22 }
  0xc7   : > { %v596_v23 = vpop.permute.xlu1 %595 }
  0xc8   : > { %599 = vst.msk [vmem:[#allocation2] sm:$0xf] %vm598_vm13, %v596_v23 }
  0xc9   : > { %v541_v24 = vpop.permute.xlu0 %540 }
  0xca   : > { %543 = vst.msk [vmem:[#allocation2 + $0x8] sm:$0xf] %vm538_vm11, %v541_v24 }
  0xcb   : > { %v571_v25 = vpop.permute.xlu1 %570 }
  0xcc   : > { %573 = vst.msk [vmem:[#allocation2 + $0x8] sm:$0xf] %vm568_vm12, %v571_v25 }
  0xcd   : > { %v515_v26 = vpop.permute.xlu0 %514 }
  0xce   : > { %517 = vst.msk [vmem:[#allocation2 + $0x10] sm:$0xf] %vm508_vm10, %v515_v26 }
  0xcf   : > { %v683_v27 = vpop.permute.xlu1 %682 }
  0xd0   : > { %685 = vst.msk [vmem:[#allocation2 + $0x4] sm:$0xf] %vm448_vm8, %v683_v27 }
  0xd1   : > { %v626_v28 = vpop.permute.xlu0 %625 }
  0xd2   : > { %629 = vst.msk [vmem:[#allocation2] sm:$0xf] %vm628_vm14, %v626_v28 }
  0xd3   : > { %v601_v29 = vpop.permute.xlu1 %600 }
  0xd4   : > { %603 = vst.msk [vmem:[#allocation2 + $0x8] sm:$0xf] %vm598_vm13, %v601_v29 }
  0xd5   : > { %v545_v30 = vpop.permute.xlu0 %544 }
  0xd6   : > { %547 = vst.msk [vmem:[#allocation2 + $0x10] sm:$0xf] %vm538_vm11, %v545_v30 }
  0xd7   : > { %v575_v31 = vpop.permute.xlu1 %574 }
  0xd8   : > { %577 = vst.msk [vmem:[#allocation2 + $0x10] sm:$0xf] %vm568_vm12, %v575_v31 }
  0xd9   : > { %v658_v33 = vpop.permute.xlu0 %657  ;;  %v933_v34 = vld [vmem:[#allocation2] sm:$0xff] }
  0xda   : > { %v694_v35 = vld [vmem:[#allocation2] sm:$0xf]  ;;  %660 = vst.msk [vmem:[#allocation2 + $0xc] sm:$0xf] %vm416_vm6, %v658_v33  ;;  %938 = vrot.lane.b32.xlu0 %v933_v34, %s1917_s18  ;;  %v937_v36 = vcombine.high %v933_v34, %v933_v34 }
  0xdb   : > { %1688 = vmatpush3.msk.msra.mxu1 %vm703_vm15, %v694_v35  ;;  %v687_v37 = vpop.permute.xlu1 %686 }
  0xdc   : > { %1697 = vmatprep.subr.mxu1 %v1914_v7  ;;  %1690 = vmatmul.mubr.msk.f32.vlgmr.msra.gmra.mxu1 %vm699_vm0, %v695_v32  ;;  %689 = vst.msk [vmem:[#allocation2 + $0xc] sm:$0xf] %vm448_vm8, %v687_v37 }
  0xdd   : > { %940 = vrot.lane.b32.xlu1 %v937_v36, %s1917_s18  ;;  %1699 = vmatprep.mubr.msk.f32.mxu1 %vm1921_vm7, %v1914_v7  ;;  %v631_v38 = vpop.permute.xlu0 %630 }
  0xde   : > { %633 = vst.msk [vmem:[#allocation2 + $0x8] sm:$0xf] %vm628_vm14, %v631_v38  ;;  %1197 = vrot.lane.b32.xlu0 %v933_v34, %s1912_s12 }
  0xdf   : > { %v662_v39 = vpop.permute.xlu1 %661 }
  0xe0   : > { %664 = vst.msk [vmem:[#allocation2 + $0x14] sm:$0xf] %vm416_vm6, %v662_v39 }
  0xe1   : > { %1199 = vrot.lane.b32.xlu1 %v937_v36, %s1912_s12  ;;  %v605_v40 = vpop.permute.xlu0 %604 }
  0xe2   : > { %607 = vst.msk [vmem:[#allocation2 + $0x10] sm:$0xf] %vm598_vm13, %v605_v40 }
  0xe3   : > { %v691_v41 = vpop.permute.xlu1 %690 }
  0xe4   : > { %693 = vst.msk [vmem:[#allocation2 + $0x14] sm:$0xf] %vm448_vm8, %v691_v41 }
  0xe5   : > { %v635_v44 = vpop.permute.xlu0 %634  ;;  %v696_v45 = vld [vmem:[#allocation2 + $0x8] sm:$0xf] }
  0xe6   : > { %v1020_v46 = vld [vmem:[#allocation2 + $0x8] sm:$0xff]  ;;  %637 = vst.msk [vmem:[#allocation2 + $0x10] sm:$0xf] %vm628_vm14, %v635_v44  ;;  %1683 = vmatpush3.msk.msra.mxu0 %vm703_vm15, %v696_v45 }
  0xe7   : > { %v1024_v47 = vcombine.high %v1020_v46, %v1020_v46  ;;  %1025 = vrot.lane.b32.xlu0 %v1020_v46, %s1917_s18  ;;  %1692 = vmatprep.subr.mxu0 %v1914_v7 }
  0xe8   : > { %1685 = vmatmul.mubr.msk.f32.vlgmr.msra.gmra.mxu0 %vm699_vm0, %v1636_v42 }
  0xe9   : > { %1027 = vrot.lane.b32.xlu1 %v1024_v47, %s1917_s18  ;;  %1694 = vmatprep.mubr.msk.f32.mxu0 %vm1921_vm7, %v1914_v7 }
  0xed   : > { %v853_v49 = vld [vmem:[#allocation2 + $0x10] sm:$0xf] }
  0xee   : > { %v1106_v50 = vld [vmem:[#allocation2 + $0x10] sm:$0xff]  ;;  %1693 = vmatpush3.msk.msra.mxu0 %vm703_vm15, %v853_v49 }
  0xef   : > { %v1110_v51 = vcombine.high %v1106_v50, %v1106_v50  ;;  %1111 = vrot.lane.b32.xlu0 %v1106_v50, %s1917_s18  ;;  %1695 = vmatmul.mubr.msk.f32.vlgmr.msra.gmra.mxu0 %vm699_vm0, %v1641_v48 }
  0xf0   : > { %1702 = vmatprep.subr.mxu0 %v1914_v7  ;;  %1704 = vmatprep.mubr.msk.f32.mxu0 %vm1921_vm7, %v1914_v7 }
  0xf1   : > { %1113 = vrot.lane.b32.xlu1 %v1110_v51, %s1917_s18 }
  0xf3   : > { %1284 = vrot.lane.b32.xlu0 %v1020_v46, %s1912_s12 }
  0xf5   : > { %1286 = vrot.lane.b32.xlu1 %v1024_v47, %s1912_s12 }
  0xf7   : > { %1370 = vrot.lane.b32.xlu0 %v1106_v50, %s1912_s12 }
  0xf9   : > { %1372 = vrot.lane.b32.xlu1 %v1110_v51, %s1912_s12  ;;  %s383_s12 = scalar_lea.vmem %s2355_s4, %s1633_s8 }
 0x14c   : > { %v939_v52 = vpop.permute.xlu0 %938 }
 0x14f   : > { %v941_v53 = vpop.permute.xlu1 %940 }
 0x150   : > { %v943_v56 = vsel %vm942_vm1, %v939_v52, %v941_v53  ;;  %v1198_v57 = vpop.permute.xlu0 %1197 }
 0x151   : > { %1698 = vmatpush3.msk.msra.mxu1 %vm703_vm15, %v943_v56 }
 0x152   : > { %1707 = vmatprep.subr.mxu1 %v1914_v7  ;;  %1700 = vmatmul.mubr.msk.f32.vlgmr.msra.gmra.mxu1 %vm699_vm0, %v1644_v54 }
 0x153   : > { %1709 = vmatprep.mubr.msk.f32.mxu1 %vm1921_vm7, %v1914_v7  ;;  %v1200_v58 = vpop.permute.xlu1 %1199 }
 0x154   : > { %v1202_v63 = vsel %vm1201_vm2, %v1198_v57, %v1200_v58 }
 0x159   : > { %v1026_v59 = vpop.permute.xlu0 %1025 }
 0x15b   : > { %v1028_v60 = vpop.permute.xlu1 %1027 }
 0x15c   : > { %v1029_v62 = vsel %vm942_vm1, %v1026_v59, %v1028_v60 }
 0x15d   : > { %1703 = vmatpush3.msk.msra.mxu0 %vm703_vm15, %v1029_v62 }
 0x15e   : > { %1712 = vmatprep.subr.mxu0 %v1914_v7  ;;  %1705 = vmatmul.mubr.msk.f32.vlgmr.msra.gmra.mxu0 %vm699_vm0, %v1647_v61 }
 0x15f   : > { %1713 = vmatpush3.msk.msra.mxu0 %vm703_vm15, %v1202_v63  ;;  %1714 = vmatprep.mubr.msk.f32.mxu0 %vm1921_vm7, %v1914_v7 }
 0x160   : > { %1722 = vmatprep.subr.mxu0 %v1914_v7 }
 0x161   : > { %v1112_v55 = vpop.permute.xlu0 %1111 }
 0x162   : > { %1715 = vmatmul.mubr.msk.f32.vlgmr.msra.gmra.mxu0 %vm699_vm0, %v1653_v0 }
 0x163   : > { %v1114_v1 = vpop.permute.xlu1 %1113  ;;  %1724 = vmatprep.mubr.msk.f32.mxu0 %vm1921_vm7, %v1914_v7 }
 0x164   : > { %v1115_v3 = vsel %vm942_vm1, %v1112_v55, %v1114_v1 }
 0x165   : > { %v1285_v4 = vpop.permute.xlu0 %1284  ;;  %1708 = vmatpush3.msk.msra.mxu1 %vm703_vm15, %v1115_v3 }
 0x166   : > { %1717 = vmatprep.subr.mxu1 %v1914_v7  ;;  %1710 = vmatmul.mubr.msk.f32.vlgmr.msra.gmra.mxu1 %vm699_vm0, %v1650_v2 }
 0x167   : > { %v1287_v43 = vpop.permute.xlu1 %1286  ;;  %1719 = vmatprep.mubr.msk.f32.mxu1 %vm1921_vm7, %v1914_v7 }
 0x168   : > { %v1288_v6 = vsel %vm1201_vm2, %v1285_v4, %v1287_v43 }
 0x169   : > { %1718 = vmatpush3.msk.msra.mxu1 %vm703_vm15, %v1288_v6  ;;  %v1371_v8 = vpop.permute.xlu0 %1370 }
 0x16a   : > { %1720 = vmatmul.mubr.msk.f32.vlgmr.msra.gmra.mxu1 %vm699_vm0, %v1656_v5 }
 0x16b   : > { %v1373_v9 = vpop.permute.xlu1 %1372 }
 0x16c   : > { %v1374_v11 = vsel %vm1201_vm2, %v1371_v8, %v1373_v9 }
 0x16d   : > { %1723 = vmatpush3.msk.msra.mxu0 %vm703_vm15, %v1374_v11 }
 0x16e   : > { %1725 = vmatmul.mubr.msk.f32.vlgmr.msra.gmra.mxu0 %vm699_vm0, %v1659_v10 }
 0x19c   : > { %v849_v7 = vpop.f32.mrf.mxu1 }
 0x19e   : > { %v1691_v12 = vpop.f32.mrf.mxu1 }
 0x1a8   : > { %v773_v13 = vpop.f32.mrf.mxu0 }
 0x1a9   : > { %v850_v14 = vadd.f32 %v849_v7, %v773_v13 }
 0x1aa   : > { %v1686_v15 = vpop.f32.mrf.mxu0 }
 0x1af   : > { %v928_v16 = vpop.f32.mrf.mxu0 }
 0x1b0   : > { %v932_v17 = vadd.f32 %v928_v16, %v850_v14 }
 0x1b1   : > { %v1696_v18 = vpop.f32.mrf.mxu0 }
 0x212   : > { %v1015_v19 = vpop.f32.mrf.mxu1 }
 0x213   : > { %v1019_v22 = vadd.f32 %v1015_v19, %v932_v17 }
 0x214   : > { %v1701_v20 = vpop.f32.mrf.mxu1 }
 0x21e   : > { %v1101_v21 = vpop.f32.mrf.mxu0 }
 0x21f   : > { %v1105_v25 = vadd.f32 %v1101_v21, %v1019_v22 }
 0x220   : > { %v1706_v23 = vpop.f32.mrf.mxu0 }
 0x222   : > { %v1274_v24 = vpop.f32.mrf.mxu0 }
 0x224   : > { %v1716_v26 = vpop.f32.mrf.mxu0 }
 0x226   : > { %v1187_v27 = vpop.f32.mrf.mxu1 }
 0x227   : > { %v1191_v28 = vadd.f32 %v1187_v27, %v1105_v25 }
 0x228   : > { %v1711_v29 = vpop.f32.mrf.mxu1 }
 0x229   : > { %v1278_v30 = vadd.f32 %v1274_v24, %v1191_v28 }
 0x22a   : > { %v1360_v31 = vpop.f32.mrf.mxu1 }
 0x22b   : > { %v1364_v33 = vadd.f32 %v1360_v31, %v1278_v30 }
 0x22c   : > { %v1721_v32 = vpop.f32.mrf.mxu1 }
 0x22e   : > { %v1446_v34 = vpop.f32.mrf.mxu0 }
 0x22f   : > { %v1450_v35 = vadd.f32 %v1446_v34, %v1364_v33 }
 0x230   : > { %v1726_v36 = vpop.f32.mrf.mxu0 }
 0x231   : > { %1451 = vst [vmem:[%s383_s12] sm:$0xff] %v1450_v35  ;;  %1452 = vadd.xlane.f32.xlu0 %v1450_v35  ;;  %v1456_v37 = vmul.f32 %v1450_v35, %v1450_v35 }
 0x233   : > { %1457 = vadd.xlane.f32.xlu1 %v1456_v37 }
 0x2ba   : > { %v1453_v38 = vpop.xlane.xlu0 %1452 }
 0x2bb   : > { %1455 = vst.msk [vmem:[%s391_s22] sm:$0xff] %vm1454_vm3, %v1453_v38 }
 0x2bc   : > { %v1458_v39 = vpop.xlane.xlu1 %1457 }
 0x2bd   : > { %1460 = vst.msk [vmem:[%s391_s22] sm:$0xff] %vm1459_vm4, %v1458_v39 }
 0x2be PF: > { %s16_s25 = sadd.s32 1, %s1898_s25   ;;  %s2359_s18 = smov %s1870_s19 }
 0x2bf   : > { %p13_p1 = scmp.ge.s32.totalorder %s16_s25, 6   ;;  %s2360_s19 = smov %s2035_s15 }
 0x2c0   : > { %s2361_s20 = smov %s1878_s21  ;;  %s2362_s21 = smov %s2032_s14 }
 0x2c1   : > { %s2363_s22 = smov %s1890_s24  ;;  %s2364_s23 = smov %s1894_s3 }
 0x2c2   : > { %s2365_s24 = smov %s2005_s28  ;;  %s2366_s3 = smov %s2370_s27 }
 0x2c3   :  { %15 = sbr.rel (!%p13_p1) target bundleno = 5 (0x5), region = 177 }

</bundles_post_ra>
